<compile_context>
chip_gen: v7x
topology: tpu7x:2x2x1
jax: 0.10.0
libtpu: 0.0.40
codegen_flags: <defaults>
</compile_context>

<pallas_src>
import jax
import jax.numpy as jnp
from jax.experimental import pallas as pl
from jax.experimental.pallas import tpu as pltpu

STATE_DIM = 24 + 3 * (3 - 1)   # 24 + 3*(num_agents-1) with 3 agents -> 30
ACTION_DIM = 2
H1 = 800
H2 = 600
OUT_PAD = 128                  # lane-dense padded output width


def actor_kernel(s_ref, w1_ref, b1_ref, w2_ref, b2_ref, w3_ref, b3_ref, out_ref):
    # layer 1: Linear(state_dim, 800) + ReLU   (bf16 MXU inputs, f32 accumulate)
    x = s_ref[...].astype(jnp.bfloat16)
    h1 = jnp.dot(x, w1_ref[...], preferred_element_type=jnp.float32)
    h1 = jnp.maximum(h1 + b1_ref[...], 0.0)
    # layer 2: Linear(800, 600) + ReLU
    h2 = jnp.dot(h1.astype(jnp.bfloat16), w2_ref[...],
                 preferred_element_type=jnp.float32)
    h2 = jnp.maximum(h2 + b2_ref[...], 0.0)
    # layer 3: Linear(600, action_dim) + Tanh   (output padded to 128 lanes)
    a = jnp.dot(h2.astype(jnp.bfloat16), w3_ref[...],
                preferred_element_type=jnp.float32)
    out_ref[...] = jnp.tanh(a + b3_ref[...]).astype(out_ref.dtype)


def actor_forward(s, params):
    """s: (B, STATE_DIM) f32.  Returns (B, ACTION_DIM) f32 actions in [-1, 1]."""
    w1, b1, w2, b2, w3p, b3p = params
    B = s.shape[0]

    # Batch tile: 256 rows per grid step (MXU-friendly height, keeps the f32
    # intermediates small enough to avoid heavy VMEM pressure).  Small batches
    # run as a single tile (block == full array dim satisfies the (8,128) rule).
    TM = B if B <= 256 else 256
    grid_m = pl.cdiv(B, TM)

    def resident(shape):
        # constant block index -> block stays resident across the whole grid,
        # DMA'd from HBM exactly once.
        return pl.BlockSpec(shape, lambda i, _n=len(shape): (0,) * _n)

    out_padded = pl.pallas_call(
        actor_kernel,
        out_shape=jax.ShapeDtypeStruct((B, OUT_PAD), jnp.float32),
        grid=(grid_m,),
        in_specs=[
            pl.BlockSpec((TM, STATE_DIM), lambda i: (i, 0)),
            resident(w1.shape), resident(b1.shape),
            resident(w2.shape), resident(b2.shape),
            resident(w3p.shape), resident(b3p.shape),
        ],
        out_specs=pl.BlockSpec((TM, OUT_PAD), lambda i: (i, 0)),
        compiler_params=pltpu.CompilerParams(
            dimension_semantics=("parallel",),  # batch axis shards across TCs (v7x)
        ),
    )(s, w1, b1, w2, b2, w3p, b3p)

    # drop the zero-padded lanes (tanh(0) = 0 there)
    return out_padded[:, :ACTION_DIM]


def init_params(key):
    """PyTorch nn.Linear-style init U(-1/sqrt(fan_in), +1/sqrt(fan_in)).

    Weights stored bf16 with layout (in, out); biases f32 (1, out).  Layer-3
    weight/bias are zero-padded to 128 output lanes for a lane-dense final store.
    """
    ks = jax.random.split(key, 6)

    def linear(kw, kb, fan_in, fan_out):
        bound = 1.0 / jnp.sqrt(float(fan_in))
        w = jax.random.uniform(kw, (fan_in, fan_out), jnp.float32, -bound, bound)
        b = jax.random.uniform(kb, (1, fan_out), jnp.float32, -bound, bound)
        return w.astype(jnp.bfloat16), b

    w1, b1 = linear(ks[0], ks[1], STATE_DIM, H1)
    w2, b2 = linear(ks[2], ks[3], H1, H2)
    w3, b3 = linear(ks[4], ks[5], H2, ACTION_DIM)

    # zero-pad layer 3 to OUT_PAD lanes (padding lanes produce tanh(0) = 0)
    w3p = jnp.zeros((H2, OUT_PAD), jnp.bfloat16).at[:, :ACTION_DIM].set(w3)
    b3p = jnp.zeros((1, OUT_PAD), jnp.float32).at[:, :ACTION_DIM].set(b3)
    return (w1, b1, w2, b2, w3p, b3p)


def actor_reference(s, params):
    """Pure-JAX reference using the same bf16-weight / f32-accumulate math."""
    w1, b1, w2, b2, w3p, b3p = params
    h = jnp.maximum(
        jnp.dot(s.astype(jnp.bfloat16), w1, preferred_element_type=jnp.float32) + b1, 0.0)
    h = jnp.maximum(
        jnp.dot(h.astype(jnp.bfloat16), w2, preferred_element_type=jnp.float32) + b2, 0.0)
    a = jnp.tanh(
        jnp.dot(h.astype(jnp.bfloat16), w3p, preferred_element_type=jnp.float32) + b3p)
    return a[:, :ACTION_DIM]


if __name__ == "__main__":
    key = jax.random.PRNGKey(0)
    k_params, k_state = jax.random.split(key)

    params = init_params(k_params)
    # small rollout-sized batch of states
    s = jax.random.normal(k_state, (8, STATE_DIM), jnp.float32)

    out = jax.block_until_ready(actor_forward(s, params))
    ref = actor_reference(s, params)

    assert out.shape == (8, ACTION_DIM)
    assert bool(jnp.all(jnp.abs(out) <= 1.0)), "tanh output out of range"
    assert jnp.allclose(out, ref, atol=2e-3, rtol=2e-3), "mismatch vs JAX reference"

    # TODO(synk): for per-step rollout (tiny batch, repeated calls) a cross-call
    # weight prefetch (P10) would hide the ~1.2 MB bf16 weight DMA entirely.

    print("KERNEL_OK")
</pallas_src>

<mosaic_0001>
module attributes {stable_mosaic.version = 11 : i64} {
  func.func @actor_kernel(%arg0: i32, %arg1: memref<8x30xf32, #tpu.memory_space<vmem>>, %arg2: memref<30x800xbf16, #tpu.memory_space<vmem>>, %arg3: memref<1x800xf32, #tpu.memory_space<vmem>>, %arg4: memref<800x600xbf16, #tpu.memory_space<vmem>>, %arg5: memref<1x600xf32, #tpu.memory_space<vmem>>, %arg6: memref<600x128xbf16, #tpu.memory_space<vmem>>, %arg7: memref<1x128xf32, #tpu.memory_space<vmem>>, %arg8: memref<8x128xf32, #tpu.memory_space<vmem>>) attributes {dimension_semantics = [#tpu.dimension_semantics<parallel>], iteration_bounds = array<i64: 1>, scalar_prefetch = 0 : i64, scratch_operands = 0 : i64, tpu.core_type = #tpu.core_type<tc>, window_params = [{transform_indices = @transform_0, window_bounds = array<i64: 8, 30>}, {pipeline_mode = #tpu.pipeline_mode<synchronous>, transform_indices = @transform_1, window_bounds = array<i64: 30, 800>}, {pipeline_mode = #tpu.pipeline_mode<synchronous>, transform_indices = @transform_2, window_bounds = array<i64: 1, 800>}, {pipeline_mode = #tpu.pipeline_mode<synchronous>, transform_indices = @transform_3, window_bounds = array<i64: 800, 600>}, {pipeline_mode = #tpu.pipeline_mode<synchronous>, transform_indices = @transform_4, window_bounds = array<i64: 1, 600>}, {pipeline_mode = #tpu.pipeline_mode<synchronous>, transform_indices = @transform_5, window_bounds = array<i64: 600, 128>}, {pipeline_mode = #tpu.pipeline_mode<synchronous>, transform_indices = @transform_6, window_bounds = array<i64: 1, 128>}, {transform_indices = @transform_7, window_bounds = array<i64: 8, 128>}]} {
    %c0 = arith.constant 0 : index
    %c0_0 = arith.constant 0 : index
    %0 = vector.load %arg1[%c0, %c0_0] : memref<8x30xf32, #tpu.memory_space<vmem>>, vector<8x30xf32>
    %1 = arith.truncf %0 : vector<8x30xf32> to vector<8x30xbf16>
    %c0_1 = arith.constant 0 : index
    %c0_2 = arith.constant 0 : index
    %2 = vector.load %arg2[%c0_1, %c0_2] : memref<30x800xbf16, #tpu.memory_space<vmem>>, vector<30x800xbf16>
    %cst = arith.constant dense<0.000000e+00> : vector<8x800xf32>
    %3 = tpu.matmul %1, %2, %cst {dimension_numbers = #tpu.dot_dimension_numbers<[1], [0], [0], [1], [0, 0, 1, 1], [], []>} : vector<8x30xbf16>, vector<30x800xbf16>, vector<8x800xf32> -> vector<8x800xf32>
    %c0_3 = arith.constant 0 : index
    %c0_4 = arith.constant 0 : index
    %4 = vector.load %arg3[%c0_3, %c0_4] : memref<1x800xf32, #tpu.memory_space<vmem>>, vector<1x800xf32>
    %5 = vector.broadcast %4 : vector<1x800xf32> to vector<8x800xf32>
    %6 = arith.addf %3, %5 : vector<8x800xf32>
    %cst_5 = arith.constant 0.000000e+00 : f32
    %7 = vector.broadcast %cst_5 : f32 to vector<8x800xf32>
    %8 = arith.maximumf %6, %7 : vector<8x800xf32>
    %9 = arith.truncf %8 : vector<8x800xf32> to vector<8x800xbf16>
    %c0_6 = arith.constant 0 : index
    %c0_7 = arith.constant 0 : index
    %10 = vector.load %arg4[%c0_6, %c0_7] : memref<800x600xbf16, #tpu.memory_space<vmem>>, vector<800x600xbf16>
    %cst_8 = arith.constant dense<0.000000e+00> : vector<8x600xf32>
    %11 = tpu.matmul %9, %10, %cst_8 {dimension_numbers = #tpu.dot_dimension_numbers<[1], [0], [0], [1], [0, 0, 1, 1], [], []>} : vector<8x800xbf16>, vector<800x600xbf16>, vector<8x600xf32> -> vector<8x600xf32>
    %c0_9 = arith.constant 0 : index
    %c0_10 = arith.constant 0 : index
    %12 = vector.load %arg5[%c0_9, %c0_10] : memref<1x600xf32, #tpu.memory_space<vmem>>, vector<1x600xf32>
    %13 = vector.broadcast %12 : vector<1x600xf32> to vector<8x600xf32>
    %14 = arith.addf %11, %13 : vector<8x600xf32>
    %cst_11 = arith.constant 0.000000e+00 : f32
    %15 = vector.broadcast %cst_11 : f32 to vector<8x600xf32>
    %16 = arith.maximumf %14, %15 : vector<8x600xf32>
    %17 = arith.truncf %16 : vector<8x600xf32> to vector<8x600xbf16>
    %c0_12 = arith.constant 0 : index
    %c0_13 = arith.constant 0 : index
    %18 = vector.load %arg6[%c0_12, %c0_13] : memref<600x128xbf16, #tpu.memory_space<vmem>>, vector<600x128xbf16>
    %cst_14 = arith.constant dense<0.000000e+00> : vector<8x128xf32>
    %19 = tpu.matmul %17, %18, %cst_14 {dimension_numbers = #tpu.dot_dimension_numbers<[1], [0], [0], [1], [0, 0, 1, 1], [], []>} : vector<8x600xbf16>, vector<600x128xbf16>, vector<8x128xf32> -> vector<8x128xf32>
    %c0_15 = arith.constant 0 : index
    %c0_16 = arith.constant 0 : index
    %20 = vector.load %arg7[%c0_15, %c0_16] : memref<1x128xf32, #tpu.memory_space<vmem>>, vector<1x128xf32>
    %21 = vector.broadcast %20 : vector<1x128xf32> to vector<8x128xf32>
    %22 = arith.addf %19, %21 : vector<8x128xf32>
    %23 = math.tanh %22 : vector<8x128xf32>
    %c0_17 = arith.constant 0 : index
    %c0_18 = arith.constant 0 : index
    %24 = vector.load %arg8[%c0_17, %c0_18] : memref<8x128xf32, #tpu.memory_space<vmem>>, vector<8x128xf32>
    tpu.vector_store %arg8[%c0_17, %c0_18], %23 {strides = array<i32>} : memref<8x128xf32, #tpu.memory_space<vmem>>, vector<8x128xf32>,
    return
  }
  func.func @transform_0(%arg0: i32) -> (i32, i32) {
    %c0_i32 = arith.constant 0 : i32
    %c0_i32_0 = arith.constant 0 : i32
    return %arg0, %c0_i32 : i32, i32
  }
  func.func @transform_1(%arg0: i32) -> (i32, i32) {
    %c0_i32 = arith.constant 0 : i32
    %c0_i32_0 = arith.constant 0 : i32
    %c0_i32_1 = arith.constant 0 : i32
    return %c0_i32, %c0_i32_0 : i32, i32
  }
  func.func @transform_2(%arg0: i32) -> (i32, i32) {
    %c0_i32 = arith.constant 0 : i32
    %c0_i32_0 = arith.constant 0 : i32
    %c0_i32_1 = arith.constant 0 : i32
    return %c0_i32, %c0_i32_0 : i32, i32
  }
  func.func @transform_3(%arg0: i32) -> (i32, i32) {
    %c0_i32 = arith.constant 0 : i32
    %c0_i32_0 = arith.constant 0 : i32
    %c0_i32_1 = arith.constant 0 : i32
    return %c0_i32, %c0_i32_0 : i32, i32
  }
  func.func @transform_4(%arg0: i32) -> (i32, i32) {
    %c0_i32 = arith.constant 0 : i32
    %c0_i32_0 = arith.constant 0 : i32
    %c0_i32_1 = arith.constant 0 : i32
    return %c0_i32, %c0_i32_0 : i32, i32
  }
  func.func @transform_5(%arg0: i32) -> (i32, i32) {
    %c0_i32 = arith.constant 0 : i32
    %c0_i32_0 = arith.constant 0 : i32
    %c0_i32_1 = arith.constant 0 : i32
    return %c0_i32, %c0_i32_0 : i32, i32
  }
  func.func @transform_6(%arg0: i32) -> (i32, i32) {
    %c0_i32 = arith.constant 0 : i32
    %c0_i32_0 = arith.constant 0 : i32
    %c0_i32_1 = arith.constant 0 : i32
    return %c0_i32, %c0_i32_0 : i32, i32
  }
  func.func @transform_7(%arg0: i32) -> (i32, i32) {
    %c0_i32 = arith.constant 0 : i32
    %c0_i32_0 = arith.constant 0 : i32
    return %arg0, %c0_i32 : i32, i32
  }
}

</mosaic_0001>

<bundles_post_ra>
// kernel: tpu_custom_call.1
= control target key start
LH: loop header
LB: loop body
LE: loop exit
PB: predicated region body
PF: predicated region fallthrough
CT: control target
= control target key end

     0   :  { %12 = vsyncpa [#allocation3], 0  ;;  %s4269_s0 = inlined_call_operand.hbm [shape: f32[8,30], index: 0, kind: input, shape index: {}]   ;;  %s4270_s1 = inlined_call_operand.hbm [shape: bf16[30,800], index: 1, kind: input, shape index: {}]   ;;  %s4271_s2 = inlined_call_operand.vmem [shape: f32[1,800], index: 2, kind: input, shape index: {}]   ;;  %s4272_s3 = inlined_call_operand.hbm [shape: bf16[800,600], index: 3, kind: input, shape index: {}]   ;;  %s4273_s4 = inlined_call_operand.vmem [shape: f32[1,600], index: 4, kind: input, shape index: {}]   ;;  %s4274_s5 = inlined_call_operand.hbm [shape: bf16[600,128], index: 5, kind: input, shape index: {}]   ;;  %s4275_s6 = inlined_call_operand.vmem [shape: f32[1,128], index: 6, kind: input, shape index: {}]   ;;  %s4276_s7 = inlined_call_operand.hbm [shape: f32[8,128], index: 7, kind: output, shape index: {}]  }
   0x1   :  { %13 = vsyncpa [#allocation6], 0 }
   0x2   :  { %14 = vsyncpa [#allocation9], 0 }
   0x3   :  { %15 = vsyncpa [#allocation4], 0  ;;  %s4026_s24 = smov [#allocation5]   ;;  %s3908_s28 = scalar_lea.hbm %s4270_s1, 1792 }
   0x4   :  { %s31_s25 = sshll.u32 %s4026_s24, 4  ;;  %p3909_p0 = scmp.ne.s32.totalorder %s4270_s1, %s3908_s28  ;;  %s32_s25 = int_to_ptr.vmem [resolvable:$true] %s31_s25 }
   0x5   :  { %p3912_p1 = scmp.lt.u32.totalorder %s3908_s28, %s4270_s1 }
   0x7   :  { %p3914_p2 = pnand %p3912_p1, %p3909_p0 }
   0x9   :  { %3917 = shalt.err (!%p3914_p2)
}
   0xa   :  { %s3918_s10 = scalar_lea.vmem %s32_s25, 1792  ;;  %p3923_p4 = scmp.lt.s32.totalorder %s32_s25, %s32_s25 }
   0xb   :  { %p3919_p3 = scmp.ne.s32.totalorder %s32_s25, %s3918_s10  ;;  %p3924_p5 = scmp.lt.s32.totalorder %s3918_s10, %s3918_s10 }
   0xd   :  { %p3925_p6 = por %p3924_p5, %p3923_p4 }
   0xf   :  { %p3926_p7 = pnand %p3925_p6, %p3919_p3 }
  0x11   :  { %3929 = shalt.err (!%p3926_p7)
}
  0x12   :  { %s4027_s11 = smov 448   ;;  %s4028_s12 = smov 28  }
  0x13   :  { %37 = dma.hbm_to_vmem [thread:$0]  %s4270_s1, 1792, %s32_s25, [#allocation6], %s4027_s11, %s4027_s11, %s4028_s12  }
  0x14   :  { %s4029_s15 = smov [#allocation2]   ;;  %s4030_s17 = smov [#allocation7]  }
  0x15   :  { %s22_s16 = sshll.u32 %s4029_s15, 4  ;;  %s45_s18 = sshll.u32 %s4030_s17, 4  ;;  %s23_s16 = int_to_ptr.vmem [resolvable:$true] %s22_s16  ;;  %s46_s18 = int_to_ptr.vmem [resolvable:$true] %s45_s18 }
  0x16   :  { %s3930_s21 = scalar_lea.hbm %s4269_s0, 128 }
  0x17   :  { %p3931_p8 = scmp.ne.s32.totalorder %s4269_s0, %s3930_s21  ;;  %p3934_p9 = scmp.lt.u32.totalorder %s3930_s21, %s4269_s0 }
  0x19   :  { %p3936_p10 = pnand %p3934_p9, %p3931_p8 }
  0x1b   :  { %3939 = shalt.err (!%p3936_p10)
}
  0x1c   :  { %s3940_s1 = scalar_lea.vmem %s23_s16, 128  ;;  %p3945_p12 = scmp.lt.s32.totalorder %s23_s16, %s23_s16 }
  0x1d   :  { %p3941_p11 = scmp.ne.s32.totalorder %s23_s16, %s3940_s1  ;;  %p3946_p13 = scmp.lt.s32.totalorder %s3940_s1, %s3940_s1 }
  0x1f   :  { %p3947_p0 = por %p3946_p13, %p3945_p12 }
  0x21   :  { %p3948_p1 = pnand %p3947_p0, %p3941_p11 }
  0x23   :  { %3951 = shalt.err (!%p3948_p1)
}
  0x24   :  { %25 = dma.hbm_to_vmem [thread:$0]  %s4269_s0, 128, %s23_s16, [#allocation3]  }
  0x25   :  { %s3952_s30 = scalar_lea.hbm %s4272_s3, 32000 }
  0x26   :  { %p3953_p2 = scmp.ne.s32.totalorder %s4272_s3, %s3952_s30  ;;  %p3956_p3 = scmp.lt.u32.totalorder %s3952_s30, %s4272_s3 }
  0x28   :  { %p3958_p4 = pnand %p3956_p3, %p3953_p2 }
  0x2a   :  { %3961 = shalt.err (!%p3958_p4)
}
  0x2b   :  { %s3962_s12 = scalar_lea.vmem %s46_s18, 32000  ;;  %p3967_p6 = scmp.lt.s32.totalorder %s46_s18, %s46_s18 }
  0x2c   :  { %p3963_p5 = scmp.ne.s32.totalorder %s46_s18, %s3962_s12  ;;  %p3968_p7 = scmp.lt.s32.totalorder %s3962_s12, %s3962_s12 }
  0x2e   :  { %p3969_p8 = por %p3968_p7, %p3967_p6 }
  0x30   :  { %p3970_p9 = pnand %p3969_p8, %p3963_p5 }
  0x32   :  { %3973 = shalt.err (!%p3970_p9)
}
  0x33   :  { %s4031_s0 = smov 320   ;;  %s4032_s13 = smov 20  }
  0x34   :  { %51 = dma.hbm_to_vmem [thread:$0]  %s4272_s3, 32000, %s46_s18, [#allocation6], %s4031_s0, %s4031_s0, %s4032_s13  }
  0x35   :  { %s4033_s16 = smov [#allocation8]   ;;  %s3974_s21 = scalar_lea.hbm %s4274_s5, 4800 }
  0x36   :  { %s59_s17 = sshll.u32 %s4033_s16, 4  ;;  %p3975_p10 = scmp.ne.s32.totalorder %s4274_s5, %s3974_s21  ;;  %s60_s17 = int_to_ptr.vmem [resolvable:$true] %s59_s17 }
  0x37   :  { %p3978_p11 = scmp.lt.u32.totalorder %s3974_s21, %s4274_s5 }
  0x39   :  { %p3980_p12 = pnand %p3978_p11, %p3975_p10 }
  0x3b   :  { %3983 = shalt.err (!%p3980_p12)
}
  0x3c   :  { %s3984_s1 = scalar_lea.vmem %s60_s17, 4800  ;;  %p3989_p0 = scmp.lt.s32.totalorder %s60_s17, %s60_s17 }
  0x3d   :  { %p3985_p13 = scmp.ne.s32.totalorder %s60_s17, %s3984_s1  ;;  %p3990_p1 = scmp.lt.s32.totalorder %s3984_s1, %s3984_s1 }
  0x3f   :  { %p3991_p2 = por %p3990_p1, %p3989_p0 }
  0x41   :  { %p3992_p3 = pnand %p3991_p2, %p3985_p13 }
  0x43   :  { %3995 = shalt.err (!%p3992_p3)
}
  0x44   :  { %s4034_s3 = smov 64   ;;  %s4035_s18 = smov 4  }
  0x45   :  { %65 = dma.hbm_to_vmem [thread:$0]  %s4274_s5, 4800, %s60_s17, [#allocation9], %s4034_s3, %s4034_s3, %s4035_s18  }
  0x46   :  { %4018 = dma.done.wait [#allocation3], 128  }
  0x47   :  { %4019 = vsyncadd [#allocation3], 4294967168 }
  0x48   :  { %4020 = dma.done.wait [#allocation6], 33792  }
  0x49   :  { %4021 = vsyncadd [#allocation6], 4294933504 }
  0x4a   :  { %4022 = dma.done.wait [#allocation9], 4800  }
  0x4b   :  { %4023 = vsyncadd [#allocation9], 4294962496  ;;  %v4036_v0 = vmov 0   ;;  %v3498_v1 = vld [vmem:[#allocation5 + $0x4] ss:$28 sps:$4 sm:$0xff]   ;;  %vm205_vm0 = vcmask 1046528  }
  0x4c   :  { %259 = vmatprep.mubr.bf16.mxu0 %v4036_v0  ;;  %300 = vmatprep.mubr.bf16.mxu1 %v4036_v0  ;;  %v3500_v2 = vld [vmem:[#allocation5] ss:$28 sps:$4 sm:$0xff]   ;;  %v3503_v4 = vld [vmem:[#allocation5 + $0x38] ss:$28 sps:$4 sm:$0x7f]   ;;  %vm201_vm1 = vcmask 244736  }
  0x4d   :  { %227 = vmatprep.subr.bf16.mxu0 %v3498_v1  ;;  %v3501_v3 = vld [vmem:[#allocation5 + $0x3c] ss:$28 sps:$4 sm:$0x7f]   ;;  %v207_v6 = vsel %vm205_vm0, %v3503_v4, 0  ;;  %v3504_v7 = vld [vmem:[#allocation5 + $0xc] ss:$28 sps:$4 sm:$0xff]  }
  0x4e   :  { %228 = vmatpush1.bf16.msra.mxu0 %v3500_v2  ;;  %v81_v5 = vld [vmem:[#allocation2] sm:$0xff]  ;;  %v3506_v8 = vld [vmem:[#allocation5 + $0x8] ss:$28 sps:$4 sm:$0xff]   ;;  %268 = vmatprep.subr.bf16.mxu1 %v3504_v7  ;;  %v3510_v12 = vld [vmem:[#allocation5 + $0x10] ss:$28 sps:$4 sm:$0xff]   ;;  %v4037_v20 = vmov 0.0  }
  0x4f   :  { %3001 = vmatprep.subr.msk.bf16.mxu0 %vm205_vm0, %v3501_v3  ;;  %v3507_v9 = vld [vmem:[#allocation5 + $0x44] ss:$28 sps:$4 sm:$0x7f]   ;;  %v82_v10 = vpack.c.bf16 %v81_v5, %v81_v5  ;;  %269 = vmatpush1.bf16.msra.mxu1 %v3506_v8  ;;  %v3512_v13 = vld [vmem:[#allocation5 + $0x14] ss:$28 sps:$4 sm:$0xff]   ;;  %vm4038_vm2 = vmmov 0  }
  0x50   :  { %v3509_v11 = vld [vmem:[#allocation5 + $0x40] ss:$28 sps:$4 sm:$0x7f]   ;;  %3003 = vmatprep.subr.msk.bf16.mxu1 %vm205_vm0, %v3507_v9  ;;  %v3513_v15 = vld [vmem:[#allocation5 + $0x4c] ss:$28 sps:$4 sm:$0x7f]  }
  0x51   :  { %v213_v14 = vsel %vm205_vm0, %v3509_v11, 0  ;;  %v3515_v16 = vld [vmem:[#allocation5 + $0x48] ss:$28 sps:$4 sm:$0x7f]   ;;  %v3516_v17 = vld [vmem:[#allocation5 + $0x18] ss:$28 sps:$4 sm:$0xff]  }
  0x52   :  { %230 = vmatpush1.bf16.msra.mxu0 %v207_v6  ;;  %v219_v18 = vsel %vm205_vm0, %v3515_v16, 0  ;;  %v3517_v19 = vld [vmem:[#allocation5 + $0x50] ss:$28 sps:$4 sm:$0x7f]   ;;  %v3520_v21 = vld [vmem:[#allocation7 + $0x4] ss:$20 sps:$4 sm:$0xff]  }
  0x53   :  { %309 = vmatprep.subr.bf16.mxu0 %v3512_v13  ;;  %271 = vmatpush1.bf16.msra.mxu1 %v213_v14  ;;  %v3518_v22 = vld [vmem:[#allocation7] ss:$20 sps:$4 sm:$0xff]   ;;  %v225_v24 = vsel %vm205_vm0, %v3517_v19, 0  ;;  %v3521_v26 = vld [vmem:[#allocation7 + $0x8] ss:$20 sps:$4 sm:$0xff]   ;;  %vm2031_vm3 = vcmask 261120  }
  0x54   :  { %3424 = vmatprep.subr.bf16.mxu1 %v4037_v20  ;;  %v3523_v23 = vld [vmem:[#allocation7 + $0xc] ss:$20 sps:$4 sm:$0xff]   ;;  %v3524_v27 = vld [vmem:[#allocation7 + $0x28] ss:$20 sps:$4 sm:$0xff]   ;;  %v3527_v30 = vld [vmem:[#allocation7 + $0x30] ss:$20 sps:$4 sm:$0xff]  }
  0x55   :  { %3002 = vmatmul.mubr.msk.bf16.vlgmr.msra.gmra.mrb[0].mxu0 %vm201_vm1, %v82_v10  ;;  %v3526_v25 = vld [vmem:[#allocation7 + $0x2c] ss:$20 sps:$4 sm:$0xff]   ;;  %v3529_v28 = vld [vmem:[#allocation7 + $0x34] ss:$20 sps:$4 sm:$0xff]   ;;  %v3530_v31 = vld [vmem:[#allocation7 + $0x50] ss:$20 sps:$4 sm:$0xff]  }
  0x56   :  { %310 = vmatpush1.bf16.msra.mxu0 %v3510_v12  ;;  %341 = vmatprep.mubr.bf16.mxu0 %v4036_v0  ;;  %v3532_v29 = vld [vmem:[#allocation7 + $0x54] ss:$20 sps:$4 sm:$0xff]   ;;  %v3535_v32 = vld [vmem:[#allocation7 + $0x5c] ss:$20 sps:$4 sm:$0xff]   ;;  %v3533_v34 = vld [vmem:[#allocation7 + $0x58] ss:$20 sps:$4 sm:$0xff]  }
  0x57   :  { %3005 = vmatprep.subr.msk.bf16.mxu0 %vm205_vm0, %v3513_v15  ;;  %3004 = vmatmul.mubr.msk.bf16.vlgmr.msra.gmra.mrb[0].mxu1 %vm201_vm1, %v82_v10  ;;  %v3538_v33 = vld [vmem:[#allocation7 + $0x7c] ss:$20 sps:$4 sm:$0xff]   ;;  %v3536_v35 = vld [vmem:[#allocation7 + $0x78] ss:$20 sps:$4 sm:$0xff]   ;;  %v3539_v38 = vld [vmem:[#allocation7 + $0x80] ss:$20 sps:$4 sm:$0xff]  }
  0x58   :  { %3425 = vmatpush3.bf16.msra.mxu1 %v3516_v17  ;;  %3428 = vmatprep.mubr.msk.bf16.mxu1 %vm4038_vm2, %v4037_v20  ;;  %v3541_v36 = vld [vmem:[#allocation7 + $0x84] ss:$20 sps:$4 sm:$0xff]   ;;  %v3542_v39 = vld [vmem:[#allocation7 + $0xa0] ss:$20 sps:$4 sm:$0xff]   ;;  %v3545_v42 = vld [vmem:[#allocation7 + $0xa8] ss:$20 sps:$4 sm:$0xff]  }
  0x59   :  { %3426 = vmatprep.subr.bf16.mxu1 %v4037_v20  ;;  %v3544_v37 = vld [vmem:[#allocation7 + $0xa4] ss:$20 sps:$4 sm:$0xff]   ;;  %v3547_v40 = vld [vmem:[#allocation7 + $0xac] ss:$20 sps:$4 sm:$0xff]   ;;  %v3548_v43 = vld [vmem:[#allocation7 + $0xc8] ss:$20 sps:$4 sm:$0xff]  }
  0x5a   :  { %312 = vmatpush1.bf16.msra.mxu0 %v219_v18  ;;  %v3550_v41 = vld [vmem:[#allocation7 + $0xcc] ss:$20 sps:$4 sm:$0xff]   ;;  %v3553_v44 = vld [vmem:[#allocation7 + $0xd4] ss:$20 sps:$4 sm:$0xff]   ;;  %v3551_v46 = vld [vmem:[#allocation7 + $0xd0] ss:$20 sps:$4 sm:$0xff]  }
  0x5b   :  { %2035 = vmatprep.subr.bf16.mxu0 %v3520_v21  ;;  %v3556_v45 = vld [vmem:[#allocation7 + $0xf4] ss:$20 sps:$4 sm:$0xff]   ;;  %v3554_v47 = vld [vmem:[#allocation7 + $0xf0] ss:$20 sps:$4 sm:$0xff]   ;;  %v3557_v50 = vld [vmem:[#allocation7 + $0xf8] ss:$20 sps:$4 sm:$0xff]  }
  0x5c   :  { %3427 = vmatpush3.bf16.msra.mxu1 %v225_v24  ;;  %v3559_v48 = vld [vmem:[#allocation7 + $0xfc] ss:$20 sps:$4 sm:$0xff]   ;;  %v3560_v51 = vld [vmem:[#allocation7 + $0x118] ss:$20 sps:$4 sm:$0xff]   ;;  %v3563_v54 = vld [vmem:[#allocation7 + $0x120] ss:$20 sps:$4 sm:$0xff]  }
  0x5d   :  { %3006 = vmatmul.mubr.msk.bf16.vlgmr.msra.gmra.mrb[4].mxu0 %vm201_vm1, %v82_v10  ;;  %2199 = vmatprep.subr.bf16.mxu1 %v3523_v23  ;;  %v3562_v49 = vld [vmem:[#allocation7 + $0x11c] ss:$20 sps:$4 sm:$0xff]   ;;  %v3565_v52 = vld [vmem:[#allocation7 + $0x124] ss:$20 sps:$4 sm:$0xff]   ;;  %v3566_v55 = vld [vmem:[#allocation7 + $0x140] ss:$20 sps:$4 sm:$0xff]  }
  0x5e   :  { %2036 = vmatpush1.bf16.msra.mxu0 %v3518_v22  ;;  %v3568_v53 = vld [vmem:[#allocation7 + $0x144] ss:$20 sps:$4 sm:$0xff]   ;;  %v3571_v56 = vld [vmem:[#allocation7 + $0x14c] ss:$20 sps:$4 sm:$0xff]   ;;  %v3569_v58 = vld [vmem:[#allocation7 + $0x148] ss:$20 sps:$4 sm:$0xff]  }
  0x5f   :  { %2037 = vmatprep.subr.bf16.mxu0 %v3526_v25  ;;  %3429 = vmatmul.mubr.msk.bf16.vlgmr.msra.gmra.mrb[4].mxu1 %vm201_vm1, %v82_v10  ;;  %v3574_v57 = vld [vmem:[#allocation7 + $0x16c] ss:$20 sps:$4 sm:$0xff]   ;;  %v3572_v59 = vld [vmem:[#allocation7 + $0x168] ss:$20 sps:$4 sm:$0xff]   ;;  %v3575_v62 = vld [vmem:[#allocation7 + $0x170] ss:$20 sps:$4 sm:$0xff]  }
  0x60   :  { %2200 = vmatpush1.bf16.msra.mxu1 %v3521_v26  ;;  %v3577_v60 = vld [vmem:[#allocation7 + $0x174] ss:$20 sps:$4 sm:$0xff]   ;;  %v3578_v63 = vld [vmem:[#allocation7 + $0x190] ss:$20 sps:$4 sm:$0xff]   ;;  %v3581_v3 = vld [vmem:[#allocation7 + $0x198] ss:$20 sps:$4 sm:$0xff]   ;;  %v101_v26 = vlaneseq }
  0x61   :  { %2201 = vmatprep.subr.bf16.mxu1 %v3529_v28  ;;  %v3580_v61 = vld [vmem:[#allocation7 + $0x194] ss:$20 sps:$4 sm:$0xff]   ;;  %v3583_v1 = vld [vmem:[#allocation7 + $0x19c] ss:$20 sps:$4 sm:$0xff]   ;;  %v3584_v4 = vld [vmem:[#allocation7 + $0x1b8] ss:$20 sps:$4 sm:$0xff]  }
  0x62   :  { %2038 = vmatpush1.bf16.msra.mxu0 %v3524_v27  ;;  %v3586_v2 = vld [vmem:[#allocation7 + $0x1bc] ss:$20 sps:$4 sm:$0xff]   ;;  %v3589_v5 = vld [vmem:[#allocation7 + $0x1c4] ss:$20 sps:$4 sm:$0xff]   ;;  %v3587_v7 = vld [vmem:[#allocation7 + $0x1c0] ss:$20 sps:$4 sm:$0xff]  }
  0x63   :  { %2039 = vmatprep.subr.bf16.mxu0 %v3532_v29  ;;  %v3592_v6 = vld [vmem:[#allocation7 + $0x1e4] ss:$20 sps:$4 sm:$0xff]   ;;  %v3590_v8 = vld [vmem:[#allocation7 + $0x1e0] ss:$20 sps:$4 sm:$0xff]   ;;  %v3593_v11 = vld [vmem:[#allocation7 + $0x1e8] ss:$20 sps:$4 sm:$0xff]  }
  0x64   :  { %2202 = vmatpush1.bf16.msra.mxu1 %v3527_v30  ;;  %v3595_v9 = vld [vmem:[#allocation7 + $0x1ec] ss:$20 sps:$4 sm:$0xff]   ;;  %v3596_v12 = vld [vmem:[#allocation7 + $0x208] ss:$20 sps:$4 sm:$0xff]   ;;  %v3599_v14 = vld [vmem:[#allocation7 + $0x210] ss:$20 sps:$4 sm:$0xff]  }
  0x65   :  { %2203 = vmatprep.subr.bf16.mxu1 %v3535_v32  ;;  %v3598_v10 = vld [vmem:[#allocation7 + $0x20c] ss:$20 sps:$4 sm:$0xff]   ;;  %v3601_v13 = vld [vmem:[#allocation7 + $0x214] ss:$20 sps:$4 sm:$0xff]   ;;  %v3607_v16 = vld [vmem:[#allocation7 + $0x23c] ss:$20 sps:$4 sm:$0xff]  }
  0x66   :  { %2040 = vmatpush1.bf16.msra.mxu0 %v3530_v31  ;;  %v3604_v15 = vld [vmem:[#allocation7 + $0x234] ss:$20 sps:$4 sm:$0xff]   ;;  %v3602_v17 = vld [vmem:[#allocation7 + $0x230] ss:$20 sps:$4 sm:$0xff]   ;;  %v3605_v18 = vld [vmem:[#allocation7 + $0x238] ss:$20 sps:$4 sm:$0xff]  }
  0x67   :  { %2041 = vmatprep.subr.bf16.mxu0 %v3538_v33  ;;  %v3610_v19 = vld [vmem:[#allocation7 + $0x25c] ss:$20 sps:$4 sm:$0xff]   ;;  %v3613_v21 = vld [vmem:[#allocation7 + $0x264] ss:$20 sps:$4 sm:$0xff]   ;;  %v3611_v23 = vld [vmem:[#allocation7 + $0x260] ss:$20 sps:$4 sm:$0xff]  }
  0x68   :  { %2204 = vmatpush1.bf16.msra.mxu1 %v3533_v34  ;;  %v3608_v22 = vld [vmem:[#allocation7 + $0x258] ss:$20 sps:$4 sm:$0xff]   ;;  %v4146_v27 = vshrl.u32 %v101_v26, 7  ;;  %vm2844_vm4 = vcmask 1043456   ;;  %vm2840_vm5 = vcmask 719872   ;;  %s4039_s8 = smov [#allocation10]  }
  0x69   :  { %2205 = vmatprep.subr.bf16.mxu1 %v3541_v36  ;;  %v3616_v24 = vld [vmem:[#allocation7 + $0x284] ss:$20 sps:$4 sm:$0xff]   ;;  %v3619_v25 = vld [vmem:[#allocation7 + $0x28c] ss:$20 sps:$4 sm:$0xff]   ;;  %s2976_s9 = sshll.u32 %s4039_s8, 4  ;;  %s2977_s9 = int_to_ptr.vmem [resolvable:$true] %s2976_s9 }
  0x6a   :  { %2042 = vmatpush1.bf16.msra.mxu0 %v3536_v35  ;;  %v103_v28 = vsub.s32 0, %v4146_v27  ;;  %v4152_v29 = vld [vmem:[%s4271_s2] sm:$0x7f]  ;;  %v107_v30 = vsub.s32 1, %v4146_v27  ;;  %v115_v33 = vsub.s32 3, %v4146_v27  ;;  %p4001_p5 = scmp.lt.s32.totalorder %s2977_s9, %s2977_s9 }
  0x6b   :  { %2043 = vmatprep.subr.bf16.mxu0 %v3544_v37  ;;  %v3656_v26 = vld [vmem:[#allocation7 + $0x398] ss:$20 sps:$4 sm:$0xff]  }
  0x6c   :  { %2206 = vmatpush1.bf16.msra.mxu1 %v3539_v38  ;;  %v104_v31 = vrot.slane %v4152_v29, %v103_v28  ;;  %v108_v32 = vrot.slane %v4152_v29, %v107_v30 }
  0x6d   :  { %2207 = vmatprep.subr.bf16.mxu1 %v3547_v40 }
  0x6e   :  { %2044 = vmatpush1.bf16.msra.mxu0 %v3542_v39  ;;  %v116_v39 = vrot.slane %v4152_v29, %v115_v33 }
  0x6f   :  { %2045 = vmatprep.subr.bf16.mxu0 %v3550_v41 }
  0x70   :  { %2208 = vmatpush1.bf16.msra.mxu1 %v3545_v42 }
  0x71   :  { %2209 = vmatprep.subr.bf16.mxu1 %v3553_v44 }
  0x72   :  { %2046 = vmatpush1.bf16.msra.mxu0 %v3548_v43 }
  0x73   :  { %2047 = vmatprep.subr.bf16.mxu0 %v3556_v45 }
  0x74   :  { %2210 = vmatpush1.bf16.msra.mxu1 %v3551_v46  ;;  %v3614_v46 = vld [vmem:[#allocation7 + $0x280] ss:$20 sps:$4 sm:$0xff]  }
  0x75   :  { %2211 = vmatprep.subr.bf16.mxu1 %v3559_v48 }
  0x76   :  { %2048 = vmatpush1.bf16.msra.mxu0 %v3554_v47  ;;  %v3617_v47 = vld [vmem:[#allocation7 + $0x288] ss:$20 sps:$4 sm:$0xff]  }
  0x77   :  { %2049 = vmatprep.subr.bf16.mxu0 %v3562_v49 }
  0x78   :  { %2212 = vmatpush1.bf16.msra.mxu1 %v3557_v50 }
  0x79   :  { %2213 = vmatprep.subr.bf16.mxu1 %v3565_v52  ;;  %v3625_v52 = vld [vmem:[#allocation7 + $0x2b4] ss:$20 sps:$4 sm:$0xff]  }
  0x7a   :  { %2050 = vmatpush1.bf16.msra.mxu0 %v3560_v51  ;;  %v3622_v51 = vld [vmem:[#allocation7 + $0x2ac] ss:$20 sps:$4 sm:$0xff]  }
  0x7b   :  { %2051 = vmatprep.subr.bf16.mxu0 %v3568_v53 }
  0x7c   :  { %2214 = vmatpush1.bf16.msra.mxu1 %v3563_v54 }
  0x7d   :  { %2215 = vmatprep.subr.bf16.mxu1 %v3571_v56 }
  0x7e   :  { %2052 = vmatpush1.bf16.msra.mxu0 %v3566_v55 }
  0x7f   :  { %2053 = vmatprep.subr.bf16.mxu0 %v3574_v57  ;;  %v3620_v57 = vld [vmem:[#allocation7 + $0x2a8] ss:$20 sps:$4 sm:$0xff]  }
  0x80   :  { %2216 = vmatpush1.bf16.msra.mxu1 %v3569_v58  ;;  %v3623_v58 = vld [vmem:[#allocation7 + $0x2b0] ss:$20 sps:$4 sm:$0xff]  }
  0x81   :  { %2217 = vmatprep.subr.bf16.mxu1 %v3577_v60 }
  0x82   :  { %2054 = vmatpush1.bf16.msra.mxu0 %v3572_v59 }
  0x83   :  { %2055 = vmatprep.subr.bf16.mxu0 %v3580_v61  ;;  %v3628_v61 = vld [vmem:[#allocation7 + $0x2d4] ss:$20 sps:$4 sm:$0xff]  }
  0x84   :  { %2218 = vmatpush1.bf16.msra.mxu1 %v3575_v62  ;;  %v3631_v62 = vld [vmem:[#allocation7 + $0x2dc] ss:$20 sps:$4 sm:$0xff]  }
  0x85   :  { %2219 = vmatprep.subr.bf16.mxu1 %v3583_v1 }
  0x86   :  { %2056 = vmatpush1.bf16.msra.mxu0 %v3578_v63 }
  0x87   :  { %2057 = vmatprep.subr.bf16.mxu0 %v3586_v2 }
  0x88   :  { %2220 = vmatpush1.bf16.msra.mxu1 %v3581_v3  ;;  %v3626_v3 = vld [vmem:[#allocation7 + $0x2d0] ss:$20 sps:$4 sm:$0xff]  }
  0x89   :  { %2221 = vmatprep.subr.bf16.mxu1 %v3589_v5 }
  0x8a   :  { %2058 = vmatpush1.bf16.msra.mxu0 %v3584_v4  ;;  %v3629_v4 = vld [vmem:[#allocation7 + $0x2d8] ss:$20 sps:$4 sm:$0xff]  }
  0x8b   :  { %2059 = vmatprep.subr.bf16.mxu0 %v3592_v6  ;;  %v3634_v6 = vld [vmem:[#allocation7 + $0x2fc] ss:$20 sps:$4 sm:$0xff]  }
  0x8c   :  { %2222 = vmatpush1.bf16.msra.mxu1 %v3587_v7  ;;  %v3637_v7 = vld [vmem:[#allocation7 + $0x304] ss:$20 sps:$4 sm:$0xff]  }
  0x8d   :  { %2223 = vmatprep.subr.bf16.mxu1 %v3595_v9  ;;  %v3632_v9 = vld [vmem:[#allocation7 + $0x2f8] ss:$20 sps:$4 sm:$0xff]  }
  0x8e   :  { %2060 = vmatpush1.bf16.msra.mxu0 %v3590_v8 }
  0x8f   :  { %2061 = vmatprep.subr.bf16.mxu0 %v3598_v10  ;;  %v3635_v10 = vld [vmem:[#allocation7 + $0x300] ss:$20 sps:$4 sm:$0xff]  }
  0x90   :  { %2224 = vmatpush1.bf16.msra.mxu1 %v3593_v11  ;;  %v3640_v11 = vld [vmem:[#allocation7 + $0x324] ss:$20 sps:$4 sm:$0xff]  }
  0x91   :  { %2225 = vmatprep.subr.bf16.mxu1 %v3601_v13  ;;  %v3638_v13 = vld [vmem:[#allocation7 + $0x320] ss:$20 sps:$4 sm:$0xff]  }
  0x92   :  { %2062 = vmatpush1.bf16.msra.mxu0 %v3596_v12  ;;  %v3643_v12 = vld [vmem:[#allocation7 + $0x32c] ss:$20 sps:$4 sm:$0xff]  }
  0x93   :  { %2063 = vmatprep.subr.bf16.mxu0 %v3604_v15  ;;  %v3646_v15 = vld [vmem:[#allocation7 + $0x34c] ss:$20 sps:$4 sm:$0xff]  }
  0x94   :  { %2226 = vmatpush1.bf16.msra.mxu1 %v3599_v14  ;;  %v3641_v14 = vld [vmem:[#allocation7 + $0x328] ss:$20 sps:$4 sm:$0xff]  }
  0x95   :  { %2227 = vmatprep.subr.bf16.mxu1 %v3607_v16  ;;  %v3649_v16 = vld [vmem:[#allocation7 + $0x354] ss:$20 sps:$4 sm:$0xff]  }
  0x96   :  { %2064 = vmatpush1.bf16.msra.mxu0 %v3602_v17  ;;  %v3644_v17 = vld [vmem:[#allocation7 + $0x348] ss:$20 sps:$4 sm:$0xff]  }
  0x97   :  { %2065 = vmatprep.subr.bf16.mxu0 %v3610_v19  ;;  %v3652_v19 = vld [vmem:[#allocation7 + $0x374] ss:$20 sps:$4 sm:$0xff]  }
  0x98   :  { %2228 = vmatpush1.bf16.msra.mxu1 %v3605_v18  ;;  %v3647_v18 = vld [vmem:[#allocation7 + $0x350] ss:$20 sps:$4 sm:$0xff]  }
  0x99   :  { %2229 = vmatprep.subr.bf16.mxu1 %v3613_v21  ;;  %v3655_v21 = vld [vmem:[#allocation7 + $0x37c] ss:$20 sps:$4 sm:$0xff]  }
  0x9a   :  { %2066 = vmatpush1.bf16.msra.mxu0 %v3608_v22  ;;  %v3650_v22 = vld [vmem:[#allocation7 + $0x370] ss:$20 sps:$4 sm:$0xff]  }
  0x9b   :  { %2076 = vmatprep.subr.bf16.mxu0 %v3616_v24  ;;  %v3658_v24 = vld [vmem:[#allocation7 + $0x39c] ss:$20 sps:$4 sm:$0xff]  }
  0x9c   :  { %2230 = vmatpush1.bf16.msra.mxu1 %v3611_v23  ;;  %v3653_v23 = vld [vmem:[#allocation7 + $0x378] ss:$20 sps:$4 sm:$0xff]  }
  0x9d   :  { %2240 = vmatprep.subr.bf16.mxu1 %v3619_v25  ;;  %v3661_v25 = vld [vmem:[#allocation7 + $0x3a4] ss:$20 sps:$4 sm:$0xff]  }
 0x128   :  { %v261_v34 = vpop.f32.mrb[0].mxu0 }
 0x129   :  { %v262_v35 = vadd.f32 %v261_v34, %v104_v31  ;;  %v263_v36 = vpop.f32.mrb[1].mxu0  ;;  %v3659_v31 = vld [vmem:[#allocation7 + $0x3a0] ss:$20 sps:$4 sm:$0xff]  }
 0x12a   :  { %v264_v37 = vadd.f32 %v263_v36, %v108_v32  ;;  %v265_v38 = vpop.f32.mrb[2].mxu0  ;;  %v4165_v43 = vpop.f32.mrb[0].mxu1  ;;  %v3664_v32 = vld [vmem:[#allocation7 + $0x3c4] ss:$20 sps:$4 sm:$0xff]   ;;  %v3667_v34 = vld [vmem:[#allocation7 + $0x3cc] ss:$20 sps:$4 sm:$0xff]  }
 0x12b   :  { %v390_v40 = vmax.f32 %v262_v35, 0.0  ;;  %v266_v41 = vpop.f32.mrb[3].mxu0  ;;  %v304_v44 = vpop.f32.mrb[1].mxu1  ;;  %v3662_v35 = vld [vmem:[#allocation7 + $0x3c0] ss:$20 sps:$4 sm:$0xff]  }
 0x12c   :  { %v391_v42 = vmax.f32 %v264_v37, 0.0  ;;  %v305_v48 = vadd.f32 %v304_v44, %v116_v39  ;;  %v306_v49 = vpop.f32.mrb[2].mxu1  ;;  %v3665_v36 = vld [vmem:[#allocation7 + $0x3c8] ss:$20 sps:$4 sm:$0xff]   ;;  %v3670_v37 = vld [vmem:[#allocation7 + $0x3ec] ss:$20 sps:$4 sm:$0xff]  }
 0x12d   :  { %v4169_v50 = vpack.c.bf16 %v390_v40, %v390_v40  ;;  %v307_v53 = vpop.f32.mrb[3].mxu1  ;;  %v3673_v38 = vld [vmem:[#allocation7 + $0x3f4] ss:$20 sps:$4 sm:$0xff]   ;;  %v3671_v40 = vld [vmem:[#allocation7 + $0x3f0] ss:$20 sps:$4 sm:$0xff]  }
 0x12e   :  { %v4167_v45 = vpack.c.bf16 %v391_v42, %v391_v42  ;;  %v393_v54 = vmax.f32 %v305_v48, 0.0  ;;  %v3668_v39 = vld [vmem:[#allocation7 + $0x3e8] ss:$20 sps:$4 sm:$0xff]   ;;  %v3674_v44 = vld [vmem:[#allocation7 + $0x410] ss:$20 sps:$4 sm:$0xff]  }
 0x12f   :  { %v3676_v41 = vld [vmem:[#allocation7 + $0x414] ss:$20 sps:$4 sm:$0xff]   ;;  %v3679_v42 = vld [vmem:[#allocation7 + $0x41c] ss:$20 sps:$4 sm:$0xff]   ;;  %v3685_v48 = vld [vmem:[#allocation7 + $0x444] ss:$20 sps:$4 sm:$0xff]  }
 0x130   :  { %2067 = vmatprep.mubr.bf16.mxu0 %v4167_v45  ;;  %2231 = vmatprep.mubr.bf16.mxu1 %v4167_v45  ;;  %v4173_v55 = vpop.f32.mrb[4].mxu0  ;;  %v4179_v59 = vpack.c.bf16 %v393_v54, %v393_v54  ;;  %v3680_v49 = vld [vmem:[#allocation7 + $0x438] ss:$20 sps:$4 sm:$0xff]   ;;  %v111_v54 = vsub.s32 2, %v4146_v27 }
 0x131   :  { %2068 = vmatmul.mubr.bf16.vlgmr.msra.gmra.mrb[8].mxu0 %v4169_v50  ;;  %2232 = vmatmul.mubr.bf16.vlgmr.msra.gmra.mrb[8].mxu1 %v4169_v50  ;;  %v4177_v56 = vpop.f32.mrb[5].mxu0  ;;  %v3691_v53 = vld [vmem:[#allocation7 + $0x46c] ss:$20 sps:$4 sm:$0xff]  }
 0x132   :  { %2077 = vmatpush1.bf16.msra.mxu0 %v3614_v46  ;;  %2241 = vmatpush1.bf16.msra.mxu1 %v3617_v47  ;;  %v347_v60 = vpop.f32.mrb[6].mxu0  ;;  %v4183_v1 = vpop.f32.mrb[4].mxu1  ;;  %v3677_v46 = vld [vmem:[#allocation7 + $0x418] ss:$20 sps:$4 sm:$0xff]   ;;  %v3682_v47 = vld [vmem:[#allocation7 + $0x43c] ss:$20 sps:$4 sm:$0xff]  }
 0x133   :  { %2078 = vmatprep.subr.bf16.mxu0 %v3622_v51  ;;  %2242 = vmatprep.subr.bf16.mxu1 %v3625_v52  ;;  %v348_v63 = vpop.f32.mrb[7].mxu0  ;;  %v3430_v2 = vpop.f32.mrb[5].mxu1  ;;  %v3683_v51 = vld [vmem:[#allocation7 + $0x440] ss:$20 sps:$4 sm:$0xff]   ;;  %v3688_v52 = vld [vmem:[#allocation7 + $0x464] ss:$20 sps:$4 sm:$0xff]  }
 0x134   :  { %2108 = vmatprep.mubr.bf16.mxu0 %v4179_v59  ;;  %2272 = vmatprep.mubr.bf16.mxu1 %v4179_v59  ;;  %v387_v5 = vpop.f32.mrb[6].mxu1  ;;  %v3694_v60 = vld [vmem:[#allocation7 + $0x48c] ss:$20 sps:$4 sm:$0xff]   ;;  %v112_v63 = vrot.slane %v4152_v29, %v111_v54  ;;  %v3692_v2 = vld [vmem:[#allocation7 + $0x488] ss:$20 sps:$4 sm:$0xff]  }
 0x135   :  { %v3431_v8 = vpop.f32.mrb[7].mxu1  ;;  %v3703_v5 = vld [vmem:[#allocation7 + $0x4bc] ss:$20 sps:$4 sm:$0xff]  }
 0x136   :  { %2079 = vmatpush1.bf16.msra.mxu0 %v3620_v57  ;;  %2243 = vmatpush1.bf16.msra.mxu1 %v3623_v58  ;;  %v3686_v57 = vld [vmem:[#allocation7 + $0x460] ss:$20 sps:$4 sm:$0xff]   ;;  %v3689_v58 = vld [vmem:[#allocation7 + $0x468] ss:$20 sps:$4 sm:$0xff]   ;;  %v3698_v8 = vld [vmem:[#allocation7 + $0x4b0] ss:$20 sps:$4 sm:$0xff]  }
 0x137   :  { %2080 = vmatprep.subr.bf16.mxu0 %v3628_v61  ;;  %2244 = vmatprep.subr.bf16.mxu1 %v3631_v62  ;;  %v3697_v61 = vld [vmem:[#allocation7 + $0x494] ss:$20 sps:$4 sm:$0xff]   ;;  %v123_v62 = vsub.s32 5, %v4146_v27 }
 0x13a   :  { %2081 = vmatpush1.bf16.msra.mxu0 %v3626_v3  ;;  %2245 = vmatpush1.bf16.msra.mxu1 %v3629_v4  ;;  %v3695_v3 = vld [vmem:[#allocation7 + $0x490] ss:$20 sps:$4 sm:$0xff]   ;;  %v3700_v4 = vld [vmem:[#allocation7 + $0x4b4] ss:$20 sps:$4 sm:$0xff]  }
 0x13b   :  { %2082 = vmatprep.subr.bf16.mxu0 %v3634_v6  ;;  %2246 = vmatprep.subr.bf16.mxu1 %v3637_v7  ;;  %v124_v6 = vrot.slane %v4152_v29, %v123_v62  ;;  %v303_v7 = vadd.f32 %v4165_v43, %v112_v63  ;;  %v3760_v62 = vld [vmem:[#allocation7 + $0x644] ss:$20 sps:$4 sm:$0xff]   ;;  %v3763_v63 = vld [vmem:[#allocation7 + $0x64c] ss:$20 sps:$4 sm:$0xff]  }
 0x13e   :  { %2083 = vmatpush1.bf16.msra.mxu0 %v3632_v9  ;;  %2247 = vmatpush1.bf16.msra.mxu1 %v3635_v10  ;;  %v3701_v9 = vld [vmem:[#allocation7 + $0x4b8] ss:$20 sps:$4 sm:$0xff]   ;;  %v3706_v10 = vld [vmem:[#allocation7 + $0x4dc] ss:$20 sps:$4 sm:$0xff]  }
 0x13f   :  { %2084 = vmatprep.subr.bf16.mxu0 %v3640_v11  ;;  %2248 = vmatprep.subr.bf16.mxu1 %v3643_v12  ;;  %v3709_v11 = vld [vmem:[#allocation7 + $0x4e4] ss:$20 sps:$4 sm:$0xff]   ;;  %v346_v12 = vadd.f32 %v4177_v56, %v124_v6  ;;  %v3721_v56 = vld [vmem:[#allocation7 + $0x534] ss:$20 sps:$4 sm:$0xff]  }
 0x140   :  { %v3764_v6 = vld [vmem:[#allocation7 + $0x668] ss:$20 sps:$4 sm:$0xff]  }
 0x141   :  { %v395_v43 = vmax.f32 %v346_v12, 0.0  ;;  %v3778_v12 = vld [vmem:[#allocation7 + $0x6bc] ss:$20 sps:$4 sm:$0xff]  }
 0x142   :  { %2085 = vmatpush1.bf16.msra.mxu0 %v3638_v13  ;;  %2249 = vmatpush1.bf16.msra.mxu1 %v3641_v14  ;;  %v392_v13 = vmax.f32 %v303_v7, 0.0  ;;  %v3704_v14 = vld [vmem:[#allocation7 + $0x4d8] ss:$20 sps:$4 sm:$0xff]   ;;  %v3767_v7 = vld [vmem:[#allocation7 + $0x670] ss:$20 sps:$4 sm:$0xff]  }
 0x143   :  { %2086 = vmatprep.subr.bf16.mxu0 %v3646_v15  ;;  %2250 = vmatprep.subr.bf16.mxu1 %v3649_v16  ;;  %v3707_v15 = vld [vmem:[#allocation7 + $0x4e0] ss:$20 sps:$4 sm:$0xff]   ;;  %v3712_v16 = vld [vmem:[#allocation7 + $0x504] ss:$20 sps:$4 sm:$0xff]  }
 0x146   :  { %2087 = vmatpush1.bf16.msra.mxu0 %v3644_v17  ;;  %2251 = vmatpush1.bf16.msra.mxu1 %v3647_v18  ;;  %v3715_v17 = vld [vmem:[#allocation7 + $0x50c] ss:$20 sps:$4 sm:$0xff]   ;;  %v4193_v18 = vpack.c.bf16 %v392_v13, %v392_v13  ;;  %v3781_v13 = vld [vmem:[#allocation7 + $0x6c4] ss:$20 sps:$4 sm:$0xff]  }
 0x147   :  { %2088 = vmatprep.subr.bf16.mxu0 %v3652_v19  ;;  %2252 = vmatprep.subr.bf16.mxu1 %v3655_v21  ;;  %v3710_v19 = vld [vmem:[#allocation7 + $0x500] ss:$20 sps:$4 sm:$0xff]   ;;  %v3713_v21 = vld [vmem:[#allocation7 + $0x508] ss:$20 sps:$4 sm:$0xff]  }
 0x14a   :  { %2089 = vmatpush1.bf16.msra.mxu0 %v3650_v22  ;;  %2253 = vmatpush1.bf16.msra.mxu1 %v3653_v23  ;;  %v3718_v22 = vld [vmem:[#allocation7 + $0x52c] ss:$20 sps:$4 sm:$0xff]   ;;  %v4195_v23 = vpack.c.bf16 %v395_v43, %v395_v43 }
 0x14b   :  { %2090 = vmatprep.subr.bf16.mxu0 %v3658_v24  ;;  %2254 = vmatprep.subr.bf16.mxu1 %v3661_v25  ;;  %v3716_v24 = vld [vmem:[#allocation7 + $0x528] ss:$20 sps:$4 sm:$0xff]   ;;  %v3719_v25 = vld [vmem:[#allocation7 + $0x530] ss:$20 sps:$4 sm:$0xff]   ;;  %v3782_v43 = vld [vmem:[#allocation7 + $0x6e0] ss:$20 sps:$4 sm:$0xff]  }
 0x14e   :  { %2091 = vmatpush1.bf16.msra.mxu0 %v3656_v26  ;;  %2255 = vmatpush1.bf16.msra.mxu1 %v3659_v31  ;;  %v3724_v26 = vld [vmem:[#allocation7 + $0x554] ss:$20 sps:$4 sm:$0xff]   ;;  %v3727_v31 = vld [vmem:[#allocation7 + $0x55c] ss:$20 sps:$4 sm:$0xff]  }
 0x14f   :  { %2092 = vmatprep.subr.bf16.mxu0 %v3664_v32  ;;  %2256 = vmatprep.subr.bf16.mxu1 %v3667_v34  ;;  %v3722_v32 = vld [vmem:[#allocation7 + $0x550] ss:$20 sps:$4 sm:$0xff]   ;;  %v3725_v34 = vld [vmem:[#allocation7 + $0x558] ss:$20 sps:$4 sm:$0xff]  }
 0x152   :  { %2093 = vmatpush1.bf16.msra.mxu0 %v3662_v35  ;;  %2257 = vmatpush1.bf16.msra.mxu1 %v3665_v36  ;;  %v3730_v35 = vld [vmem:[#allocation7 + $0x57c] ss:$20 sps:$4 sm:$0xff]   ;;  %v3733_v36 = vld [vmem:[#allocation7 + $0x584] ss:$20 sps:$4 sm:$0xff]  }
 0x153   :  { %2094 = vmatprep.subr.bf16.mxu0 %v3670_v37  ;;  %2258 = vmatprep.subr.bf16.mxu1 %v3673_v38  ;;  %v3728_v37 = vld [vmem:[#allocation7 + $0x578] ss:$20 sps:$4 sm:$0xff]   ;;  %v3731_v38 = vld [vmem:[#allocation7 + $0x580] ss:$20 sps:$4 sm:$0xff]  }
 0x156   :  { %2095 = vmatpush1.bf16.msra.mxu0 %v3668_v39  ;;  %2259 = vmatpush1.bf16.msra.mxu1 %v3671_v40  ;;  %v3736_v39 = vld [vmem:[#allocation7 + $0x5a4] ss:$20 sps:$4 sm:$0xff]   ;;  %v3739_v40 = vld [vmem:[#allocation7 + $0x5ac] ss:$20 sps:$4 sm:$0xff]  }
 0x157   :  { %2096 = vmatprep.subr.bf16.mxu0 %v3676_v41  ;;  %2260 = vmatprep.subr.bf16.mxu1 %v3679_v42  ;;  %v3734_v41 = vld [vmem:[#allocation7 + $0x5a0] ss:$20 sps:$4 sm:$0xff]   ;;  %v3737_v42 = vld [vmem:[#allocation7 + $0x5a8] ss:$20 sps:$4 sm:$0xff]  }
 0x15a   :  { %2097 = vmatpush1.bf16.msra.mxu0 %v3674_v44  ;;  %2261 = vmatpush1.bf16.msra.mxu1 %v3677_v46  ;;  %v3742_v44 = vld [vmem:[#allocation7 + $0x5cc] ss:$20 sps:$4 sm:$0xff]   ;;  %v3745_v46 = vld [vmem:[#allocation7 + $0x5d4] ss:$20 sps:$4 sm:$0xff]  }
 0x15b   :  { %2098 = vmatprep.subr.bf16.mxu0 %v3682_v47  ;;  %2262 = vmatprep.subr.bf16.mxu1 %v3685_v48  ;;  %v3740_v47 = vld [vmem:[#allocation7 + $0x5c8] ss:$20 sps:$4 sm:$0xff]   ;;  %v3743_v48 = vld [vmem:[#allocation7 + $0x5d0] ss:$20 sps:$4 sm:$0xff]  }
 0x15e   :  { %2099 = vmatpush1.bf16.msra.mxu0 %v3680_v49  ;;  %2263 = vmatpush1.bf16.msra.mxu1 %v3683_v51  ;;  %v3748_v49 = vld [vmem:[#allocation7 + $0x5f4] ss:$20 sps:$4 sm:$0xff]   ;;  %v3751_v51 = vld [vmem:[#allocation7 + $0x5fc] ss:$20 sps:$4 sm:$0xff]  }
 0x15f   :  { %2100 = vmatprep.subr.bf16.mxu0 %v3688_v52  ;;  %2264 = vmatprep.subr.bf16.mxu1 %v3691_v53  ;;  %v3746_v52 = vld [vmem:[#allocation7 + $0x5f0] ss:$20 sps:$4 sm:$0xff]   ;;  %v3749_v53 = vld [vmem:[#allocation7 + $0x5f8] ss:$20 sps:$4 sm:$0xff]  }
 0x162   :  { %2101 = vmatpush1.bf16.msra.mxu0 %v3686_v57  ;;  %2265 = vmatpush1.bf16.msra.mxu1 %v3689_v58  ;;  %v3754_v57 = vld [vmem:[#allocation7 + $0x61c] ss:$20 sps:$4 sm:$0xff]   ;;  %v3757_v58 = vld [vmem:[#allocation7 + $0x624] ss:$20 sps:$4 sm:$0xff]  }
 0x163   :  { %2102 = vmatprep.subr.bf16.mxu0 %v3694_v60  ;;  %2266 = vmatprep.subr.bf16.mxu1 %v3697_v61  ;;  %v3752_v60 = vld [vmem:[#allocation7 + $0x618] ss:$20 sps:$4 sm:$0xff]   ;;  %v3755_v61 = vld [vmem:[#allocation7 + $0x620] ss:$20 sps:$4 sm:$0xff]  }
 0x166   :  { %2103 = vmatpush1.bf16.msra.mxu0 %v3692_v2  ;;  %2267 = vmatpush1.bf16.msra.mxu1 %v3695_v3  ;;  %v3758_v2 = vld [vmem:[#allocation7 + $0x640] ss:$20 sps:$4 sm:$0xff]   ;;  %v3761_v3 = vld [vmem:[#allocation7 + $0x648] ss:$20 sps:$4 sm:$0xff]  }
 0x167   :  { %2104 = vmatprep.subr.bf16.mxu0 %v3700_v4  ;;  %2268 = vmatprep.subr.bf16.mxu1 %v3703_v5  ;;  %v3766_v4 = vld [vmem:[#allocation7 + $0x66c] ss:$20 sps:$4 sm:$0xff]   ;;  %v3769_v5 = vld [vmem:[#allocation7 + $0x674] ss:$20 sps:$4 sm:$0xff]  }
 0x16a   :  { %2105 = vmatpush1.bf16.msra.mxu0 %v3698_v8  ;;  %2269 = vmatpush1.bf16.msra.mxu1 %v3701_v9  ;;  %v3772_v8 = vld [vmem:[#allocation7 + $0x694] ss:$20 sps:$4 sm:$0xff]   ;;  %v3775_v9 = vld [vmem:[#allocation7 + $0x69c] ss:$20 sps:$4 sm:$0xff]  }
 0x16b   :  { %2106 = vmatprep.subr.bf16.mxu0 %v3706_v10  ;;  %2270 = vmatprep.subr.bf16.mxu1 %v3709_v11  ;;  %v3770_v10 = vld [vmem:[#allocation7 + $0x690] ss:$20 sps:$4 sm:$0xff]   ;;  %v3773_v11 = vld [vmem:[#allocation7 + $0x698] ss:$20 sps:$4 sm:$0xff]  }
 0x16e   :  { %2107 = vmatpush1.bf16.msra.mxu0 %v3704_v14  ;;  %2271 = vmatpush1.bf16.msra.mxu1 %v3707_v15  ;;  %v3776_v14 = vld [vmem:[#allocation7 + $0x6b8] ss:$20 sps:$4 sm:$0xff]   ;;  %v3779_v15 = vld [vmem:[#allocation7 + $0x6c0] ss:$20 sps:$4 sm:$0xff]  }
 0x16f   :  { %2117 = vmatprep.subr.bf16.mxu0 %v3712_v16  ;;  %2281 = vmatprep.subr.bf16.mxu1 %v3715_v17  ;;  %v3784_v16 = vld [vmem:[#allocation7 + $0x6e4] ss:$20 sps:$4 sm:$0xff]   ;;  %v3787_v17 = vld [vmem:[#allocation7 + $0x6ec] ss:$20 sps:$4 sm:$0xff]  }
 0x171   :  { %2109 = vmatmul.mubr.bf16.vlgmr.msra.gmra.mrb[8].mxu0 %v4193_v18  ;;  %2273 = vmatmul.mubr.bf16.vlgmr.msra.gmra.mrb[8].mxu1 %v4193_v18 }
 0x172   :  { %2118 = vmatpush1.bf16.msra.mxu0 %v3710_v19  ;;  %2282 = vmatpush1.bf16.msra.mxu1 %v3713_v21  ;;  %v3785_v19 = vld [vmem:[#allocation7 + $0x6e8] ss:$20 sps:$4 sm:$0xff]   ;;  %v3790_v21 = vld [vmem:[#allocation7 + $0x70c] ss:$20 sps:$4 sm:$0xff]  }
 0x173   :  { %2119 = vmatprep.subr.bf16.mxu0 %v3718_v22  ;;  %2283 = vmatprep.subr.bf16.mxu1 %v3721_v56  ;;  %v3793_v22 = vld [vmem:[#allocation7 + $0x714] ss:$20 sps:$4 sm:$0xff]   ;;  %v119_v56 = vsub.s32 4, %v4146_v27 }
 0x174   :  { %2149 = vmatprep.mubr.bf16.mxu0 %v4195_v23  ;;  %2313 = vmatprep.mubr.bf16.mxu1 %v4195_v23 }
 0x176   :  { %2120 = vmatpush1.bf16.msra.mxu0 %v3716_v24  ;;  %2284 = vmatpush1.bf16.msra.mxu1 %v3719_v25  ;;  %v3788_v24 = vld [vmem:[#allocation7 + $0x708] ss:$20 sps:$4 sm:$0xff]   ;;  %v3791_v25 = vld [vmem:[#allocation7 + $0x710] ss:$20 sps:$4 sm:$0xff]  }
 0x177   :  { %2121 = vmatprep.subr.bf16.mxu0 %v3724_v26  ;;  %2285 = vmatprep.subr.bf16.mxu1 %v3727_v31  ;;  %v120_v26 = vrot.slane %v4152_v29, %v119_v56  ;;  %v3796_v31 = vld [vmem:[#allocation7 + $0x734] ss:$20 sps:$4 sm:$0xff]  }
 0x17a   :  { %2122 = vmatpush1.bf16.msra.mxu0 %v3722_v32  ;;  %2286 = vmatpush1.bf16.msra.mxu1 %v3725_v34  ;;  %v3799_v32 = vld [vmem:[#allocation7 + $0x73c] ss:$20 sps:$4 sm:$0xff]  }
 0x17b   :  { %2123 = vmatprep.subr.bf16.mxu0 %v3730_v35  ;;  %2287 = vmatprep.subr.bf16.mxu1 %v3733_v36  ;;  %v3794_v34 = vld [vmem:[#allocation7 + $0x730] ss:$20 sps:$4 sm:$0xff]   ;;  %v3797_v35 = vld [vmem:[#allocation7 + $0x738] ss:$20 sps:$4 sm:$0xff]   ;;  %v344_v36 = vadd.f32 %v4173_v55, %v120_v26  ;;  %v3806_v55 = vld [vmem:[#allocation7 + $0x780] ss:$20 sps:$4 sm:$0xff]  }
 0x17c   :  { %v3847_v26 = vld [vmem:[#allocation7 + $0x4e8] ss:$20 sps:$4 sm:$0xff]  }
 0x17e   :  { %2124 = vmatpush1.bf16.msra.mxu0 %v3728_v37  ;;  %2288 = vmatpush1.bf16.msra.mxu1 %v3731_v38  ;;  %v3802_v37 = vld [vmem:[#allocation7 + $0x75c] ss:$20 sps:$4 sm:$0xff]   ;;  %v3805_v38 = vld [vmem:[#allocation7 + $0x764] ss:$20 sps:$4 sm:$0xff]  }
 0x17f   :  { %2125 = vmatprep.subr.bf16.mxu0 %v3736_v39  ;;  %2289 = vmatprep.subr.bf16.mxu1 %v3739_v40  ;;  %v127_v39 = vsub.s32 6, %v4146_v27  ;;  %v3800_v40 = vld [vmem:[#allocation7 + $0x758] ss:$20 sps:$4 sm:$0xff]  }
 0x182   :  { %2126 = vmatpush1.bf16.msra.mxu0 %v3734_v41  ;;  %2290 = vmatpush1.bf16.msra.mxu1 %v3737_v42  ;;  %v3803_v41 = vld [vmem:[#allocation7 + $0x760] ss:$20 sps:$4 sm:$0xff]   ;;  %v394_v42 = vmax.f32 %v344_v36, 0.0  ;;  %v3852_v36 = vld [vmem:[#allocation7 + $0x790] ss:$20 sps:$4 sm:$0xff]  }
 0x183   :  { %2127 = vmatprep.subr.bf16.mxu0 %v3742_v44  ;;  %2291 = vmatprep.subr.bf16.mxu1 %v3745_v46  ;;  %v3808_v44 = vld [vmem:[#allocation7 + $0x784] ss:$20 sps:$4 sm:$0xff]   ;;  %v3811_v46 = vld [vmem:[#allocation7 + $0x78c] ss:$20 sps:$4 sm:$0xff]  }
 0x186   :  { %2128 = vmatpush1.bf16.msra.mxu0 %v3740_v47  ;;  %2292 = vmatpush1.bf16.msra.mxu1 %v3743_v48  ;;  %v128_v47 = vrot.slane %v4152_v29, %v127_v39  ;;  %v3809_v48 = vld [vmem:[#allocation7 + $0x788] ss:$20 sps:$4 sm:$0xff]   ;;  %v3815_v29 = vld [vmem:[#allocation7 + $0x7b0] ss:$20 sps:$4 sm:$0xff]   ;;  %v3855_v39 = vld [vmem:[#allocation7 + $0x7b8] ss:$20 sps:$4 sm:$0xff]  }
 0x187   :  { %2129 = vmatprep.subr.bf16.mxu0 %v3748_v49  ;;  %2293 = vmatprep.subr.bf16.mxu1 %v3751_v51  ;;  %v4208_v49 = vpack.c.bf16 %v394_v42, %v394_v42  ;;  %v3814_v51 = vld [vmem:[#allocation7 + $0x7ac] ss:$20 sps:$4 sm:$0xff]  }
 0x188   :  { %v3857_v42 = vld [vmem:[#allocation7 + $0x560] ss:$20 sps:$4 sm:$0xff]  }
 0x18a   :  { %2130 = vmatpush1.bf16.msra.mxu0 %v3746_v52  ;;  %2294 = vmatpush1.bf16.msra.mxu1 %v3749_v53  ;;  %v3817_v52 = vld [vmem:[#allocation7 + $0x7b4] ss:$20 sps:$4 sm:$0xff]   ;;  %v385_v53 = vadd.f32 %v4183_v1, %v128_v47  ;;  %v3820_v1 = vld [vmem:[#allocation7 + $0x10] ss:$20 sps:$4 sm:$0xff]   ;;  %v3874_v47 = vld [vmem:[#allocation8 + $0x8] sm:$0xff]  }
 0x18b   :  { %2131 = vmatprep.subr.bf16.mxu0 %v3754_v57  ;;  %2295 = vmatprep.subr.bf16.mxu1 %v3757_v58  ;;  %v3812_v57 = vld [vmem:[#allocation7 + $0x7a8] ss:$20 sps:$4 sm:$0xff]   ;;  %v3818_v58 = vld [vmem:[#allocation7 + $0x150] ss:$20 sps:$4 sm:$0xff]  }
 0x18e   :  { %2132 = vmatpush1.bf16.msra.mxu0 %v3752_v60  ;;  %2296 = vmatpush1.bf16.msra.mxu1 %v3755_v61  ;;  %v3819_v60 = vld [vmem:[#allocation7 + $0x3d0] ss:$20 sps:$4 sm:$0xff]   ;;  %v396_v61 = vmax.f32 %v385_v53, 0.0  ;;  %v3880_v53 = vld [vmem:[#allocation8 + $0x58] sm:$0xff]  }
 0x18f   :  { %2133 = vmatprep.subr.bf16.mxu0 %v3760_v62  ;;  %2297 = vmatprep.subr.bf16.mxu1 %v3763_v63  ;;  %v3821_v63 = vld [vmem:[#allocation7 + $0x290] ss:$20 sps:$4 sm:$0xff]  }
 0x190   :  { %v4215_v62 = vpack.c.bf16 %v396_v61, %v396_v61  ;;  %v3865_v61 = vld [vmem:[#allocation7 + $0x600] ss:$20 sps:$4 sm:$0xff]  }
 0x192   :  { %2134 = vmatpush1.bf16.msra.mxu0 %v3758_v2  ;;  %2298 = vmatpush1.bf16.msra.mxu1 %v3761_v3  ;;  %v3822_v2 = vld [vmem:[#allocation7 + $0x178] ss:$20 sps:$4 sm:$0xff]  }
 0x193   :  { %2135 = vmatprep.subr.bf16.mxu0 %v3766_v4  ;;  %2299 = vmatprep.subr.bf16.mxu1 %v3769_v5  ;;  %v3823_v3 = vld [vmem:[#allocation7 + $0x3f8] ss:$20 sps:$4 sm:$0xff]   ;;  %v3826_v5 = vld [vmem:[#allocation7 + $0x1a0] ss:$20 sps:$4 sm:$0xff]  }
 0x194   :  { %v3825_v4 = vld [vmem:[#allocation7 + $0x2b8] ss:$20 sps:$4 sm:$0xff]  }
 0x196   :  { %2136 = vmatpush1.bf16.msra.mxu0 %v3764_v6  ;;  %2300 = vmatpush1.bf16.msra.mxu1 %v3767_v7  ;;  %v3827_v6 = vld [vmem:[#allocation7 + $0x420] ss:$20 sps:$4 sm:$0xff]  }
 0x197   :  { %2137 = vmatprep.subr.bf16.mxu0 %v3772_v8  ;;  %2301 = vmatprep.subr.bf16.mxu1 %v3775_v9  ;;  %v3828_v7 = vld [vmem:[#allocation7 + $0x60] ss:$20 sps:$4 sm:$0xff]   ;;  %v3830_v9 = vld [vmem:[#allocation7 + $0x1c8] ss:$20 sps:$4 sm:$0xff]  }
 0x198   :  { %v3829_v8 = vld [vmem:[#allocation7 + $0x2e0] ss:$20 sps:$4 sm:$0xff]  }
 0x19a   :  { %2138 = vmatpush1.bf16.msra.mxu0 %v3770_v10  ;;  %2302 = vmatpush1.bf16.msra.mxu1 %v3773_v11  ;;  %v3831_v10 = vld [vmem:[#allocation7 + $0x448] ss:$20 sps:$4 sm:$0xff]  }
 0x19b   :  { %2139 = vmatprep.subr.bf16.mxu0 %v3778_v12  ;;  %2303 = vmatprep.subr.bf16.mxu1 %v3781_v13  ;;  %v3832_v11 = vld [vmem:[#allocation7 + $0x88] ss:$20 sps:$4 sm:$0xff]   ;;  %v3836_v13 = vld [vmem:[#allocation7 + $0xb0] ss:$20 sps:$4 sm:$0xff]  }
 0x19c   :  { %v3833_v12 = vld [vmem:[#allocation7 + $0x308] ss:$20 sps:$4 sm:$0xff]  }
 0x19e   :  { %2140 = vmatpush1.bf16.msra.mxu0 %v3776_v14  ;;  %2304 = vmatpush1.bf16.msra.mxu1 %v3779_v15  ;;  %v3837_v14 = vld [vmem:[#allocation7 + $0x330] ss:$20 sps:$4 sm:$0xff]   ;;  %v3838_v15 = vld [vmem:[#allocation7 + $0x218] ss:$20 sps:$4 sm:$0xff]  }
 0x19f   :  { %2141 = vmatprep.subr.bf16.mxu0 %v3784_v16  ;;  %2305 = vmatprep.subr.bf16.mxu1 %v3787_v17  ;;  %v3839_v16 = vld [vmem:[#allocation7 + $0x498] ss:$20 sps:$4 sm:$0xff]  }
 0x1a0   :  { %v3840_v17 = vld [vmem:[#allocation7 + $0xd8] ss:$20 sps:$4 sm:$0xff]  }
 0x1a2   :  { %2142 = vmatpush1.bf16.msra.mxu0 %v3782_v43  ;;  %2306 = vmatpush1.bf16.msra.mxu1 %v3785_v19  ;;  %v3841_v43 = vld [vmem:[#allocation7 + $0x358] ss:$20 sps:$4 sm:$0xff]   ;;  %v3842_v19 = vld [vmem:[#allocation7 + $0x240] ss:$20 sps:$4 sm:$0xff]  }
 0x1a3   :  { %2143 = vmatprep.subr.bf16.mxu0 %v3790_v21  ;;  %2307 = vmatprep.subr.bf16.mxu1 %v3793_v22  ;;  %v3843_v21 = vld [vmem:[#allocation7 + $0x4c0] ss:$20 sps:$4 sm:$0xff]  }
 0x1a4   :  { %v3844_v22 = vld [vmem:[#allocation7 + $0x100] ss:$20 sps:$4 sm:$0xff]  }
 0x1a6   :  { %2144 = vmatpush1.bf16.msra.mxu0 %v3788_v24  ;;  %2308 = vmatpush1.bf16.msra.mxu1 %v3791_v25  ;;  %v3845_v24 = vld [vmem:[#allocation7 + $0x380] ss:$20 sps:$4 sm:$0xff]   ;;  %v3846_v25 = vld [vmem:[#allocation7 + $0x268] ss:$20 sps:$4 sm:$0xff]  }
 0x1a7   :  { %2145 = vmatprep.subr.bf16.mxu0 %v3796_v31  ;;  %2309 = vmatprep.subr.bf16.mxu1 %v3799_v32  ;;  %v3848_v31 = vld [vmem:[#allocation7 + $0x128] ss:$20 sps:$4 sm:$0xff]  }
 0x1a8   :  { %v3849_v32 = vld [vmem:[#allocation7 + $0x3a8] ss:$20 sps:$4 sm:$0xff]  }
 0x1aa   :  { %2146 = vmatpush1.bf16.msra.mxu0 %v3794_v34  ;;  %2310 = vmatpush1.bf16.msra.mxu1 %v3797_v35  ;;  %v3850_v34 = vld [vmem:[#allocation7 + $0x650] ss:$20 sps:$4 sm:$0xff]  }
 0x1ab   :  { %2147 = vmatprep.subr.bf16.mxu0 %v3802_v37  ;;  %2311 = vmatprep.subr.bf16.mxu1 %v3805_v38  ;;  %v3851_v35 = vld [vmem:[#allocation7 + $0x510] ss:$20 sps:$4 sm:$0xff]   ;;  %v3853_v37 = vld [vmem:[#allocation7 + $0x678] ss:$20 sps:$4 sm:$0xff]  }
 0x1ac   :  { %v3854_v38 = vld [vmem:[#allocation7 + $0x538] ss:$20 sps:$4 sm:$0xff]  }
 0x1ae   :  { %2148 = vmatpush1.bf16.msra.mxu0 %v3800_v40  ;;  %2312 = vmatpush1.bf16.msra.mxu1 %v3803_v41  ;;  %v3856_v40 = vld [vmem:[#allocation7 + $0x6a0] ss:$20 sps:$4 sm:$0xff]  }
 0x1af   :  { %2158 = vmatprep.subr.bf16.mxu0 %v3808_v44  ;;  %2322 = vmatprep.subr.bf16.mxu1 %v3811_v46  ;;  %v3868_v41 = vld [vmem:[#allocation8 + $0x40] sm:$0xff]   ;;  %v3872_v44 = vld [vmem:[#allocation8 + $0x48] sm:$0xff]  }
 0x1b0   :  { %v3860_v46 = vld [vmem:[#allocation7 + $0x6f0] ss:$20 sps:$4 sm:$0xff]  }
 0x1b1   :  { %2150 = vmatmul.mubr.bf16.vlgmr.msra.gmra.mrb[8].mxu0 %v4208_v49  ;;  %2314 = vmatmul.mubr.bf16.vlgmr.msra.gmra.mrb[8].mxu1 %v4208_v49 }
 0x1b2   :  { %2159 = vmatpush1.bf16.msra.mxu0 %v3806_v55  ;;  %2323 = vmatpush1.bf16.msra.mxu1 %v3809_v48  ;;  %v3876_v55 = vld [vmem:[#allocation8 + $0x50] sm:$0xff]  }
 0x1b3   :  { %2160 = vmatprep.subr.bf16.mxu0 %v3814_v51  ;;  %2324 = vmatprep.subr.bf16.mxu1 %v3817_v52  ;;  %v3861_v48 = vld [vmem:[#allocation7 + $0x5b0] ss:$20 sps:$4 sm:$0xff]   ;;  %v3862_v51 = vld [vmem:[#allocation7 + $0x718] ss:$20 sps:$4 sm:$0xff]  }
 0x1b4   :  { %2190 = vmatprep.mubr.bf16.mxu0 %v4036_v0  ;;  %2354 = vmatprep.mubr.bf16.mxu1 %v4036_v0  ;;  %v3824_v0 = vld [vmem:[#allocation7 + $0x38] ss:$20 sps:$4 sm:$0xff]   ;;  %v3878_v52 = vld [vmem:[#allocation8 + $0x10] sm:$0xff]  }
 0x1b6   :  { %2161 = vmatpush1.bf16.msra.mxu0 %v3812_v57  ;;  %2325 = vmatpush1.bf16.msra.mxu1 %v3815_v29  ;;  %v3863_v57 = vld [vmem:[#allocation7 + $0x5d8] ss:$20 sps:$4 sm:$0xff]   ;;  %v3864_v29 = vld [vmem:[#allocation7 + $0x740] ss:$20 sps:$4 sm:$0xff]  }
 0x1b7   :  { %3304 = vmatprep.subr.bf16.mxu0 %v3818_v58  ;;  %3326 = vmatprep.subr.bf16.mxu1 %v3819_v60  ;;  %v3882_v58 = vld [vmem:[#allocation8 + $0x18] sm:$0xff]   ;;  %v3884_v60 = vld [vmem:[#allocation8 + $0x60] sm:$0xff]  }
 0x1bd   :  { %3258 = vmatmul.mubr.msk.bf16.vlgmr.msra.gmra.mrb[8].mxu0 %vm2031_vm3, %v4215_v62  ;;  %3259 = vmatmul.mubr.msk.bf16.vlgmr.msra.gmra.mrb[8].mxu1 %vm2031_vm3, %v4215_v62 }
 0x1be   :  { %3305 = vmatpush3.bf16.msra.mxu0 %v3820_v1  ;;  %3327 = vmatpush3.bf16.msra.mxu1 %v3821_v63  ;;  %v3886_v1 = vld [vmem:[#allocation8 + $0x20] sm:$0xff]   ;;  %v3888_v63 = vld [vmem:[#allocation8 + $0x68] sm:$0xff]  }
 0x1bf   :  { %2395 = vmatprep.mubr.bf16.mxu0 %v4167_v45  ;;  %2435 = vmatprep.mubr.bf16.mxu1 %v4179_v59  ;;  %v3834_v45 = vld [vmem:[#allocation7 + $0x1f0] ss:$20 sps:$4 sm:$0xff]  }
 0x1c0   :  { %3306 = vmatprep.subr.bf16.mxu0 %v3822_v2  ;;  %3328 = vmatprep.subr.bf16.mxu1 %v3823_v3  ;;  %v3835_v59 = vld [vmem:[#allocation7 + $0x470] ss:$20 sps:$4 sm:$0xff]   ;;  %v3867_v2 = vld [vmem:[#allocation7 + $0x628] ss:$20 sps:$4 sm:$0xff]  }
 0x1c1   :  { %v3869_v3 = vld [vmem:[#allocation8 + $0xc0] sm:$0xff]  }
 0x1c2   :  { %3307 = vmatpush3.bf16.msra.mxu0 %v3824_v0  ;;  %3329 = vmatpush3.bf16.msra.mxu1 %v3825_v4  ;;  %v3890_v0 = vld [vmem:[#allocation8 + $0x28] sm:$0xff]   ;;  %v3871_v4 = vld [vmem:[#allocation8 + $0x80] sm:$0xff]  }
 0x1c3   :  { %3308 = vmatprep.subr.bf16.mxu0 %v3826_v5  ;;  %3330 = vmatprep.subr.bf16.mxu1 %v3827_v6  ;;  %v3873_v5 = vld [vmem:[#allocation8 + $0xc8] sm:$0xff]  }
 0x1c4   :  { %v3875_v6 = vld [vmem:[#allocation8 + $0x88] sm:$0xff]  }
 0x1c6   :  { %3309 = vmatpush3.bf16.msra.mxu0 %v3828_v7  ;;  %3331 = vmatpush3.bf16.msra.mxu1 %v3829_v8  ;;  %v3877_v7 = vld [vmem:[#allocation8 + $0xd0] sm:$0xff]  }
 0x1c7   :  { %3310 = vmatprep.subr.bf16.mxu0 %v3830_v9  ;;  %3332 = vmatprep.subr.bf16.mxu1 %v3831_v10  ;;  %v3879_v8 = vld [vmem:[#allocation8 + $0x90] sm:$0xff]   ;;  %v3881_v9 = vld [vmem:[#allocation8 + $0xd8] sm:$0xff]  }
 0x1c8   :  { %v3883_v10 = vld [vmem:[#allocation8 + $0x98] sm:$0xff]  }
 0x1ca   :  { %3311 = vmatpush3.bf16.msra.mxu0 %v3832_v11  ;;  %3333 = vmatpush3.bf16.msra.mxu1 %v3833_v12  ;;  %v3885_v11 = vld [vmem:[#allocation8 + $0xe0] sm:$0xff]  }
 0x1cb   :  { %3312 = vmatprep.subr.bf16.mxu0 %v3834_v45  ;;  %3334 = vmatprep.subr.bf16.mxu1 %v3835_v59  ;;  %v3887_v12 = vld [vmem:[#allocation8 + $0xa0] sm:$0xff]   ;;  %v3889_v45 = vld [vmem:[#allocation8 + $0xe8] sm:$0xff]  }
 0x1cc   :  { %v3891_v59 = vld [vmem:[#allocation8 + $0xa8] sm:$0xff]  }
 0x1ce   :  { %3313 = vmatpush3.bf16.msra.mxu0 %v3836_v13  ;;  %3335 = vmatpush3.bf16.msra.mxu1 %v3837_v14  ;;  %v3893_v13 = vld [vmem:[#allocation8 + $0xf0] sm:$0xff]  }
 0x1cf   :  { %3314 = vmatprep.subr.bf16.mxu0 %v3838_v15  ;;  %3336 = vmatprep.subr.bf16.mxu1 %v3839_v16  ;;  %v3894_v14 = vld [vmem:[#allocation8 + $0x30] sm:$0xff]   ;;  %v3896_v16 = vld [vmem:[#allocation8 + $0x78] sm:$0xff]  }
 0x1d0   :  { %v3895_v15 = vld [vmem:[#allocation8 + $0xb0] sm:$0xff]  }
 0x1d2   :  { %3315 = vmatpush3.bf16.msra.mxu0 %v3840_v17  ;;  %3337 = vmatpush3.bf16.msra.mxu1 %v3841_v43  ;;  %v3897_v17 = vld [vmem:[#allocation8 + $0xf8] sm:$0xff]  }
 0x1d3   :  { %3316 = vmatprep.subr.bf16.mxu0 %v3842_v19  ;;  %3338 = vmatprep.subr.bf16.mxu1 %v3843_v21  ;;  %v3898_v43 = vld [vmem:[#allocation8 + $0x38] sm:$0xff]  }
 0x1d4   :  { %v3899_v19 = vld [vmem:[#allocation8 + $0xb8] sm:$0xff]  }
 0x1d5   :  { %v704_v21 = vld [vmem:[%s4273_s4] sm:$0x1f] }
 0x1d6   :  { %3317 = vmatpush3.bf16.msra.mxu0 %v3844_v22  ;;  %3339 = vmatpush3.bf16.msra.mxu1 %v3845_v24  ;;  %v709_v22 = vrot.slane %v704_v21, %v103_v28  ;;  %v717_v24 = vrot.slane %v704_v21, %v111_v54 }
 0x1d7   :  { %3318 = vmatprep.subr.bf16.mxu0 %v3846_v25  ;;  %3340 = vmatprep.subr.bf16.mxu1 %v3847_v26  ;;  %v713_v25 = vrot.slane %v704_v21, %v107_v30  ;;  %v721_v26 = vrot.slane %v704_v21, %v115_v33 }
 0x1da   :  { %3319 = vmatpush3.bf16.msra.mxu0 %v3848_v31  ;;  %3341 = vmatpush3.bf16.msra.mxu1 %v3849_v32 }
 0x1db   :  { %3348 = vmatprep.subr.bf16.mxu0 %v3850_v34  ;;  %3432 = vmatprep.subr.bf16.mxu1 %v4037_v20 }
 0x1dd   :  { %2396 = vmatmul.mubr.bf16.vlgmr.msra.gmra.mrb[12].mxu0 %v4169_v50  ;;  %2436 = vmatmul.mubr.bf16.vlgmr.msra.gmra.mrb[12].mxu1 %v4193_v18  ;;  %v3858_v50 = vld [vmem:[#allocation7 + $0x6c8] ss:$20 sps:$4 sm:$0xff]   ;;  %v3870_v18 = vld [vmem:[#allocation8] sm:$0xff]  }
 0x1de   :  { %3349 = vmatpush3.bf16.msra.mxu0 %v3851_v35  ;;  %2475 = vmatprep.mubr.bf16.mxu0 %v4195_v23  ;;  %v3859_v23 = vld [vmem:[#allocation7 + $0x588] ss:$20 sps:$4 sm:$0xff]  }
 0x1df   :  { %3433 = vmatpush3.bf16.msra.mxu1 %v3852_v36  ;;  %3350 = vmatprep.subr.bf16.mxu0 %v3853_v37 }
 0x1e0   :  { %3434 = vmatprep.subr.bf16.mxu1 %v4037_v20  ;;  %3436 = vmatprep.mubr.msk.bf16.mxu1 %vm4038_vm2, %v4037_v20 }
 0x1e2   :  { %3351 = vmatpush3.bf16.msra.mxu0 %v3854_v38 }
 0x1e3   :  { %3435 = vmatpush3.bf16.msra.mxu1 %v3855_v39  ;;  %3352 = vmatprep.subr.bf16.mxu0 %v3856_v40 }
 0x1e4   :  { %3373 = vmatprep.subr.bf16.mxu1 %v3868_v41 }
 0x1e6   :  { %3437 = vmatmul.mubr.msk.bf16.vlgmr.msra.gmra.mrb[16].mxu1 %vm2031_vm3, %v4215_v62  ;;  %3353 = vmatpush3.bf16.msra.mxu0 %v3857_v42  ;;  %v3866_v62 = vld [vmem:[#allocation7 + $0x768] ss:$20 sps:$4 sm:$0xff]  }
 0x1e7   :  { %3354 = vmatprep.subr.bf16.mxu0 %v3858_v50  ;;  %3374 = vmatpush3.bf16.msra.mxu1 %v3870_v18 }
 0x1e8   :  { %3375 = vmatprep.subr.bf16.mxu1 %v3872_v44 }
 0x1ea   :  { %3355 = vmatpush3.bf16.msra.mxu0 %v3859_v23 }
 0x1eb   :  { %3356 = vmatprep.subr.bf16.mxu0 %v3860_v46  ;;  %3376 = vmatpush3.bf16.msra.mxu1 %v3874_v47  ;;  %v3900_v46 = vld [vmem:[#allocation8 + $0x100] sm:$0xff]  }
 0x1ec   :  { %3377 = vmatprep.subr.bf16.mxu1 %v3876_v55  ;;  %v3901_v55 = vld [vmem:[#allocation8 + $0x108] sm:$0xff]  }
 0x1ee   :  { %3357 = vmatpush3.bf16.msra.mxu0 %v3861_v48  ;;  %v3902_v48 = vld [vmem:[#allocation8 + $0x110] sm:$0xff]  }
 0x1ef   :  { %3358 = vmatprep.subr.bf16.mxu0 %v3862_v51  ;;  %3378 = vmatpush3.bf16.msra.mxu1 %v3878_v52  ;;  %v3903_v51 = vld [vmem:[#allocation8 + $0x118] sm:$0xff]   ;;  %v3904_v52 = vld [vmem:[#allocation8 + $0x120] sm:$0xff]  }
 0x1f0   :  { %3379 = vmatprep.subr.bf16.mxu1 %v3880_v53  ;;  %v3905_v53 = vld [vmem:[#allocation8 + $0x128] ss:$0 sps:$4 sm:$0xff]  }
 0x1f2   :  { %3359 = vmatpush3.bf16.msra.mxu0 %v3863_v57  ;;  %v2846_v57 = vsel %vm2844_vm4, %v3905_v53, 0 }
 0x1f3   :  { %3360 = vmatprep.subr.bf16.mxu0 %v3864_v29  ;;  %3380 = vmatpush3.bf16.msra.mxu1 %v3882_v58 }
 0x1f4   :  { %3381 = vmatprep.subr.bf16.mxu1 %v3884_v60  ;;  %v725_v60 = vrot.slane %v704_v21, %v119_v56 }
 0x1f6   :  { %3361 = vmatpush3.bf16.msra.mxu0 %v3865_v61 }
 0x1f7   :  { %3362 = vmatprep.subr.bf16.mxu0 %v3866_v62  ;;  %3382 = vmatpush3.bf16.msra.mxu1 %v3886_v1 }
 0x1f8   :  { %3383 = vmatprep.subr.bf16.mxu1 %v3888_v63 }
 0x1fa   :  { %3363 = vmatpush3.bf16.msra.mxu0 %v3867_v2 }
 0x1fb   :  { %3395 = vmatprep.subr.bf16.mxu0 %v3869_v3  ;;  %3384 = vmatpush3.bf16.msra.mxu1 %v3890_v0 }
 0x1fd   :  { %2476 = vmatmul.mubr.bf16.vlgmr.msra.gmra.mrb[16].mxu0 %v4208_v49  ;;  %v3892_v49 = vld [vmem:[#allocation8 + $0x70] sm:$0xff]  }
 0x1fe   :  { %3396 = vmatpush3.bf16.msra.mxu0 %v3871_v4  ;;  %3385 = vmatprep.subr.bf16.mxu1 %v3892_v49 }
 0x1ff   :  { %3397 = vmatprep.subr.bf16.mxu0 %v3873_v5  ;;  %3386 = vmatpush3.bf16.msra.mxu1 %v3894_v14 }
 0x200   :  { %3387 = vmatprep.subr.bf16.mxu1 %v3896_v16  ;;  %v3261_v16 = vld [vmem:[%s4275_s6] ss:$0 sm:$0xff]  ;;  %s3996_s6 = scalar_lea.vmem %s2977_s9, 128 }
 0x201   :  { %p3997_p4 = scmp.ne.s32.totalorder %s2977_s9, %s3996_s6  ;;  %p4002_p6 = scmp.lt.s32.totalorder %s3996_s6, %s3996_s6 }
 0x202   :  { %3398 = vmatpush3.bf16.msra.mxu0 %v3875_v6 }
 0x203   :  { %3399 = vmatprep.subr.bf16.mxu0 %v3877_v7  ;;  %3388 = vmatpush3.bf16.msra.mxu1 %v3898_v43  ;;  %p4003_p7 = por %p4002_p6, %p4001_p5 }
 0x204   :  { %3440 = vmatprep.subr.bf16.mxu1 %v4037_v20 }
 0x205   :  { %p4004_p8 = pnand %p4003_p7, %p3997_p4 }
 0x206   :  { %3400 = vmatpush3.bf16.msra.mxu0 %v3879_v8 }
 0x207   :  { %3401 = vmatprep.subr.bf16.mxu0 %v3881_v9 }
 0x20a   :  { %3402 = vmatpush3.bf16.msra.mxu0 %v3883_v10 }
 0x20b   :  { %3403 = vmatprep.subr.bf16.mxu0 %v3885_v11 }
 0x20e   :  { %3404 = vmatpush3.bf16.msra.mxu0 %v3887_v12 }
 0x20f   :  { %3405 = vmatprep.subr.bf16.mxu0 %v3889_v45 }
 0x212   :  { %3406 = vmatpush3.bf16.msra.mxu0 %v3891_v59 }
 0x213   :  { %3407 = vmatprep.subr.bf16.mxu0 %v3893_v13 }
 0x216   :  { %3408 = vmatpush3.bf16.msra.mxu0 %v3895_v15 }
 0x217   :  { %3409 = vmatprep.subr.bf16.mxu0 %v3897_v17 }
 0x21a   :  { %3410 = vmatpush3.bf16.msra.mxu0 %v3899_v19 }
 0x290   :  { %v2192_v31 = vpop.f32.mrb[8].mxu0  ;;  %v2356_v32 = vpop.f32.mrb[8].mxu1 }
 0x291   :  { %v3456_v34 = vadd.f32 %v2192_v31, %v709_v22  ;;  %v3458_v35 = vadd.f32 %v2356_v32, %v717_v24  ;;  %v2194_v36 = vpop.f32.mrb[9].mxu0  ;;  %v2358_v37 = vpop.f32.mrb[9].mxu1 }
 0x292   :  { %v3457_v38 = vadd.f32 %v2194_v36, %v713_v25  ;;  %v3459_v39 = vadd.f32 %v2358_v37, %v721_v26  ;;  %v2196_v40 = vpop.f32.mrb[10].mxu0  ;;  %v2360_v41 = vpop.f32.mrb[10].mxu1 }
 0x293   :  { %v2523_v28 = vmax.f32 %v3456_v34, 0.0  ;;  %v2525_v42 = vmax.f32 %v3458_v35, 0.0  ;;  %v2197_v50 = vpop.f32.mrb[11].mxu0  ;;  %v2361_v54 = vpop.f32.mrb[11].mxu1 }
 0x294   :  { %v2524_v18 = vmax.f32 %v3457_v38, 0.0  ;;  %v2526_v44 = vmax.f32 %v3459_v39, 0.0 }
 0x295   :  { %v2528_v33 = vpack.c.bf16 %v2523_v28, %v2523_v28  ;;  %v2530_v47 = vpack.c.bf16 %v2525_v42, %v2525_v42 }
 0x296   :  { %v2529_v30 = vpack.c.bf16 %v2524_v18, %v2524_v18  ;;  %v2531_v23 = vpack.c.bf16 %v2526_v44, %v2526_v44 }
 0x298   :  { %2880 = vmatprep.mubr.bf16.mxu1 %v2529_v30  ;;  %2920 = vmatprep.mubr.bf16.mxu0 %v2531_v23 }
 0x299   :  { %2881 = vmatmul.mubr.bf16.vlgmr.msra.gmra.mrb[20].mxu1 %v2528_v33  ;;  %2921 = vmatmul.mubr.bf16.vlgmr.msra.gmra.mrb[20].mxu0 %v2530_v47 }
 0x29a   :  { %3441 = vmatpush3.bf16.msra.mxu1 %v3900_v46  ;;  %3452 = vmatprep.mubr.msk.bf16.mxu1 %vm4038_vm2, %v4037_v20 }
 0x29b   :  { %3442 = vmatprep.subr.bf16.mxu1 %v4037_v20 }
 0x29e   :  { %3443 = vmatpush3.bf16.msra.mxu1 %v3901_v55 }
 0x29f   :  { %3444 = vmatprep.subr.bf16.mxu1 %v4037_v20 }
 0x2a2   :  { %3445 = vmatpush3.bf16.msra.mxu1 %v3902_v48 }
 0x2a3   :  { %3446 = vmatprep.subr.bf16.mxu1 %v4037_v20 }
 0x2a6   :  { %3447 = vmatpush3.bf16.msra.mxu1 %v3903_v51 }
 0x2a7   :  { %3448 = vmatprep.subr.bf16.mxu1 %v4037_v20 }
 0x2aa   :  { %3449 = vmatpush3.bf16.msra.mxu1 %v3904_v52 }
 0x2ab   :  { %3450 = vmatprep.subr.bf16.mxu1 %v4037_v20 }
 0x2ae   :  { %3451 = vmatpush3.bf16.msra.mxu1 %v2846_v57 }
 0x2b0   :  { %v3320_v29 = vpop.f32.mrb[12].mxu0  ;;  %v3342_v58 = vpop.f32.mrb[12].mxu1 }
 0x2b1   :  { %v3321_v61 = vpop.f32.mrb[13].mxu0  ;;  %v3343_v62 = vpop.f32.mrb[13].mxu1 }
 0x2b2   :  { %v3322_v1 = vadd.f32 %v3321_v61, %v3320_v29  ;;  %v3344_v63 = vadd.f32 %v3343_v62, %v3342_v58  ;;  %v3323_v2 = vpop.f32.mrb[14].mxu0  ;;  %v3345_v3 = vpop.f32.mrb[14].mxu1 }
 0x2b3   :  { %v3324_v0 = vpop.f32.mrb[15].mxu0  ;;  %v3346_v4 = vpop.f32.mrb[15].mxu1 }
 0x2b4   :  { %v2398_v5 = vadd.f32 %v3322_v1, %v725_v60 }
 0x2b6   :  { %v2438_v6 = vadd.f32 %v3344_v63, %v2398_v5 }
 0x2b9   :  { %v2517_v7 = vpop.f32.mrb[16].mxu1 }
 0x2ba   :  { %v3438_v8 = vpop.f32.mrb[17].mxu1 }
 0x2bb   :  { %v2520_v20 = vpop.f32.mrb[18].mxu1 }
 0x2bc   :  { %v3439_v9 = vpop.f32.mrb[19].mxu1 }
 0x2d0   :  { %v3364_v10 = vpop.f32.mrb[16].mxu0 }
 0x2d1   :  { %v3365_v11 = vpop.f32.mrb[17].mxu0 }
 0x2d2   :  { %v3366_v12 = vadd.f32 %v3365_v11, %v3364_v10  ;;  %v3367_v45 = vpop.f32.mrb[18].mxu0 }
 0x2d3   :  { %v3368_v27 = vpop.f32.mrb[19].mxu0 }
 0x2d4   :  { %v2478_v56 = vadd.f32 %v3366_v12, %v2438_v6 }
 0x2d6   :  { %v2518_v59 = vadd.f32 %v2517_v7, %v2478_v56 }
 0x2d8   :  { %v2527_v49 = vmax.f32 %v2518_v59, 0.0 }
 0x2da   :  { %v2532_v13 = vpack.c.bf16 %v2527_v49, %v2527_v49 }
 0x2dc   :  { %3453 = vmatmul.mubr.msk.bf16.vlgmr.msra.gmra.mrb[24].mxu1 %vm2840_vm5, %v2532_v13 }
 0x36c   :  { %v3389_v14 = vpop.f32.mrb[20].mxu1  ;;  %v3411_v15 = vpop.f32.mrb[20].mxu0 }
 0x36d   :  { %v3390_v17 = vpop.f32.mrb[21].mxu1  ;;  %v3412_v43 = vpop.f32.mrb[21].mxu0 }
 0x36e   :  { %v3391_v19 = vadd.f32 %v3390_v17, %v3389_v14  ;;  %v3413_v21 = vadd.f32 %v3412_v43, %v3411_v15  ;;  %v3392_v22 = vpop.f32.mrb[22].mxu1  ;;  %v3414_v24 = vpop.f32.mrb[22].mxu0 }
 0x36f   :  { %v3393_v25 = vpop.f32.mrb[23].mxu1  ;;  %v3415_v26 = vpop.f32.mrb[23].mxu0 }
 0x370   :  { %v2883_v31 = vadd.f32 %v3391_v19, %v3261_v16 }
 0x372   :  { %v2923_v32 = vadd.f32 %v3413_v21, %v2883_v31 }
 0x3af   :  { %v2962_v34 = vpop.f32.mrb[24].mxu1 }
 0x3b0   :  { %v2963_v35 = vadd.f32 %v2962_v34, %v2923_v32  ;;  %v3454_v36 = vpop.f32.mrb[25].mxu1 }
 0x3b1   :  { %v2965_v37 = vpop.f32.mrb[26].mxu1 }
 0x3b2   :  { %3906 = vtanh.f32 %v2963_v35  ;;  %v3455_v38 = vpop.f32.mrb[27].mxu1 }
 0x3bc   :  { %v3907_v39 = vpop.eup %3906 }
 0x3bd   :  { %2969 = vst [vmem:[#allocation10] sm:$0xff] %v3907_v39 }
 0x3be   :  { %4007 = shalt.err (!%p4004_p8)
}
 0x3bf   :  { %s4008_s12 = scalar_lea.hbm %s4276_s7, 128 }
 0x3c0   :  { %p4009_p9 = scmp.ne.s32.totalorder %s4276_s7, %s4008_s12  ;;  %p4012_p10 = scmp.lt.u32.totalorder %s4008_s12, %s4276_s7 }
 0x3c2   :  { %p4014_p11 = pnand %p4012_p10, %p4009_p9 }
 0x3c4   :  { %4017 = shalt.err (!%p4014_p11)
}
 0x3c5   :  { %2979 = dma.vmem_to_hbm [thread:$0]  %s2977_s9, 128, %s4276_s7, [#allocation4]  }
 0x3c6   :  { %4024 = dma.done.wait [#allocation4], 128  }
 0x3c7   :  { %4025 = vsyncadd [#allocation4], 4294967168 }
 0x3c8   :  { %2983 = vsyncpa [#allocation3], 1 }
 0x3c9   :  { %2984 = vsyncpa [#allocation6], 1 }
 0x3ca   :  { %2985 = vsyncpa [#allocation9], 1 }
 0x3cb   :  { %2986 = vsyncpa [#allocation4], 1 }

</bundles_post_ra>
